<compile_context>
chip_gen: v5e
topology: v5e:2x2
jax: 0.10.0
libtpu: 0.0.40
codegen_flags: <defaults>
</compile_context>

<pallas_src>
import functools

import jax
import jax.numpy as jnp
import numpy as np
from jax.experimental import pallas as pl
from jax.experimental.pallas import tpu as pltpu


# ----------------------------------------------------------------------------
# Kernel 1: conv3x3 (single folded-K matmul) + pixel-shuffle/NCHW store + BN stats.
# ----------------------------------------------------------------------------
def conv_ps_stats_kernel(x_ref, wb_ref, g_ref, y_ref, sum_ref, sq_ref):
    # x_ref  : (B_blk*H, K_pad)   bf16  im2row'd input rows (3 dy taps folded into K)
    # wb_ref : (K_pad, 4*C*W)     bf16  banded conv weights, columns ordered (c, i, w, j)
    # g_ref  : (4*C*W, 128)       f32   hoisted column -> channel grouping matrix
    # y_ref  : (B_blk, C, H, 4*W) bf16  un-normalized conv output, already NCHW layout
    # sum_ref/sq_ref : (1, 128)   f32   per-channel batch sums (resident accumulators)
    b_blk, C, H, W4 = y_ref.shape

    # One MXU matmul per grid step (M = B_blk*H, K folded), f32 accumulation.
    acc = jnp.dot(x_ref[...], wb_ref[...], preferred_element_type=jnp.float32)

    # Channel-major store: with (c, i, w, j) column order, columns [c*4W, (c+1)*4W) of the
    # row for (b, h) are exactly out[b, c, 2h:2h+2, :] of the pixel-shuffled NCHW output,
    # so pixel shuffle + NHWC->NCHW are handled purely by store addressing.
    acc_b = acc.reshape(b_blk, H, C * W4)
    for c in range(C):                                    # static unroll
        y_ref[:, c, :, :] = acc_b[:, :, c * W4:(c + 1) * W4].astype(y_ref.dtype)

    # BN batch statistics from the f32 accumulator, grouped per channel on the MXU with the
    # precomputed 0/1 matrix; accumulated across the batch grid axis.
    rs = jnp.sum(acc, axis=0, keepdims=True)              # (1, 4*C*W)
    rs2 = jnp.sum(acc * acc, axis=0, keepdims=True)

    @pl.when(pl.program_id(0) == 0)
    def _():
        sum_ref[...] = jnp.zeros_like(sum_ref)
        sq_ref[...] = jnp.zeros_like(sq_ref)

    sum_ref[...] += jnp.dot(rs, g_ref[...], preferred_element_type=jnp.float32)
    sq_ref[...] += jnp.dot(rs2, g_ref[...], preferred_element_type=jnp.float32)


def conv_ps_stats(x2d, wb, g, N, C, H, W, b_blk):
    K_pad = x2d.shape[1]
    n_cols = 4 * C * W
    return pl.pallas_call(
        conv_ps_stats_kernel,
        out_shape=(
            jax.ShapeDtypeStruct((N, C, H, 4 * W), jnp.bfloat16),   # bf16 intermediate
            jax.ShapeDtypeStruct((1, 128), jnp.float32),
            jax.ShapeDtypeStruct((1, 128), jnp.float32),
        ),
        grid_spec=pltpu.PrefetchScalarGridSpec(
            num_scalar_prefetch=0,
            grid=(N // b_blk,),
            in_specs=[
                pl.BlockSpec((b_blk * H, K_pad), lambda n: (n, 0)),
                pl.BlockSpec((K_pad, n_cols), lambda n: (0, 0)),    # constant index map
                pl.BlockSpec((n_cols, 128), lambda n: (0, 0)),      # constant index map
            ],
            out_specs=(
                pl.BlockSpec((b_blk, C, H, 4 * W), lambda n: (n, 0, 0, 0)),
                pl.BlockSpec((1, 128), lambda n: (0, 0)),           # resident accumulator
                pl.BlockSpec((1, 128), lambda n: (0, 0)),
            ),
        ),
        # Batch-block axis must stay "arbitrary": the stats outputs accumulate across it.
        compiler_params=pltpu.CompilerParams(dimension_semantics=("arbitrary",)),
    )(x2d, wb, g)


# ----------------------------------------------------------------------------
# Kernel 2: lane-dense streaming pass -> per-channel FMA, output already NCHW.
# ----------------------------------------------------------------------------
def bn_apply_kernel(y_ref, scale_ref, shift_ref, o_ref):
    # y_ref : (B_blk, C, 4*H*W) bf16  NCHW conv output (lane-dense: 4*H*W lanes)
    # scale_ref/shift_ref : (C, 1) f32 folded BN scale / shift
    # o_ref : (B_blk, C, 4*H*W) f32  final NCHW output
    y = y_ref[...].astype(jnp.float32)
    o_ref[...] = y * scale_ref[...][None] + shift_ref[...][None]


def bn_apply(y_flat, scale, shift, b_blk):
    N, C, S = y_flat.shape
    return pl.pallas_call(
        bn_apply_kernel,
        out_shape=jax.ShapeDtypeStruct((N, C, S), jnp.float32),
        grid_spec=pltpu.PrefetchScalarGridSpec(
            num_scalar_prefetch=0,
            grid=(N // b_blk,),
            in_specs=[
                pl.BlockSpec((b_blk, C, S), lambda n: (n, 0, 0)),
                pl.BlockSpec((C, 1), lambda n: (0, 0)),
                pl.BlockSpec((C, 1), lambda n: (0, 0)),
            ],
            out_specs=pl.BlockSpec((b_blk, C, S), lambda n: (n, 0, 0)),
        ),
        compiler_params=pltpu.CompilerParams(dimension_semantics=("parallel",)),
    )(y_flat, scale, shift)


# ----------------------------------------------------------------------------
# Wrapper: banded-weight / grouping-matrix construction + scale/shift fold (tiny XLA glue).
# ----------------------------------------------------------------------------
def _build_banded_weights(w_oihw, W, C):
    # w_oihw: (4*C, Cin, 3, 3) PyTorch conv weight; PixelShuffle maps o = 4*c + 2*i + j.
    # Returns B: (3*(W+2)*Cin, 4*C*W) with
    #   B[dy*(W+2)*Cin + w_in*Cin + cin, c*4W + i*2W + 2w + j]
    #     = weight[4c+2i+j, cin, dy, w_in - w]   (0 if w_in - w not in {0,1,2}).
    Cin = w_oihw.shape[1]
    w6 = w_oihw.reshape(C, 2, 2, Cin, 3, 3)                          # (c, i, j, cin, dy, dx)
    win = jnp.arange(W + 2)[:, None]
    wout = jnp.arange(W)[None, :]
    dx = win - wout                                                  # (W+2, W)
    valid = (dx >= 0) & (dx <= 2)
    g = w6[:, :, :, :, :, jnp.clip(dx, 0, 2)]                        # (C,2,2,Cin,3,W+2,W)
    g = jnp.where(valid[None, None, None, None, None, :, :], g, 0.0)
    B = jnp.transpose(g, (4, 5, 3, 0, 1, 6, 2))                      # (dy,w_in,cin,c,i,w,j)
    return B.reshape(3 * (W + 2) * Cin, 4 * C * W)


def _pick_batch_block(N, H, target_m=256):
    # Largest divisor of N whose matmul M-dim (b*H) stays <= target: fills MXU rows while
    # keeping the per-step VMEM footprint bounded.  At the demo shapes this is simply N.
    best = 1
    for b in range(1, N + 1):
        if N % b == 0 and b * H <= max(target_m, H):
            best = b
    return best


@functools.partial(jax.jit, static_argnames=("out_channels",))
def pixel_shuffle_block(x_nchw, w_oihw, gamma, beta, *, out_channels):
    N, Cin, H, W = x_nchw.shape
    C = out_channels
    H2, W2 = 2 * H, 2 * W
    K = 3 * (W + 2) * Cin
    K_pad = ((K + 127) // 128) * 128
    n_cols = 4 * C * W

    # Tiny XLA prologue on the (16x smaller) input: NCHW->NHWC, 1-px halo pad, im2row
    # (fold the 3 dy taps into K), zero-pad K to a lane multiple, bf16 cast.
    x_nhwc = jnp.transpose(x_nchw, (0, 2, 3, 1))
    x_pad = jnp.pad(x_nhwc, ((0, 0), (1, 1), (1, 1), (0, 0)))
    x_pad = x_pad.reshape(N, H + 2, (W + 2) * Cin)
    x_rows = jnp.concatenate([x_pad[:, dy:dy + H] for dy in range(3)], axis=-1)
    x2d = jnp.pad(x_rows.reshape(N * H, K), ((0, 0), (0, K_pad - K))).astype(jnp.bfloat16)

    wb = _build_banded_weights(w_oihw, W, C)
    wb = jnp.pad(wb, ((0, K_pad - K), (0, 0))).astype(jnp.bfloat16)

    # Hoisted column->channel grouping matrix (columns ordered (c,i,w,j) => col // 4W = c),
    # padded to 128 stats lanes so the resident accumulator stores are unmasked.
    ch_of_col = jnp.arange(n_cols) // (4 * W)
    g = (ch_of_col[:, None] == jnp.arange(128)[None, :]).astype(jnp.float32)

    b_blk = _pick_batch_block(N, H)

    # Kernel 1: conv (single folded-K matmul) + pixel-shuffle/NCHW store + BN batch stats.
    inter, csum, csq = conv_ps_stats(x2d, wb, g, N, C, H, W, b_blk)

    # Fold batch stats (training-mode BN, biased variance, eps=1e-5) into scale/shift.
    count = N * H2 * W2
    mean = csum[0, :C] / count
    var = csq[0, :C] / count - mean * mean
    inv = jax.lax.rsqrt(var + 1e-5)
    scale = (gamma * inv).reshape(C, 1).astype(jnp.float32)
    shift = (beta - mean * gamma * inv).reshape(C, 1).astype(jnp.float32)

    # Kernel 2: lane-dense (C, 4*H*W) streaming FMA; the intermediate is already in NCHW
    # layout, so both reshapes below are free row-major views (no XLA transpose pass).
    y_flat = inter.reshape(N, C, H2 * W2)
    out = bn_apply(y_flat, scale, shift, b_blk)
    return out.reshape(N, C, H2, W2)


# ----------------------------------------------------------------------------
# Pure-JAX reference (same math via XLA) for a correctness check.
# ----------------------------------------------------------------------------
def reference(x_nchw, w_oihw, gamma, beta, out_channels):
    w_hwio = jnp.transpose(w_oihw, (2, 3, 1, 0))
    x_nhwc = jnp.transpose(x_nchw, (0, 2, 3, 1))
    conv = jax.lax.conv_general_dilated(
        x_nhwc, w_hwio, window_strides=(1, 1), padding=((1, 1), (1, 1)),
        dimension_numbers=("NHWC", "HWIO", "NHWC"))
    N, H, W, _ = conv.shape
    C = out_channels
    ps = conv.reshape(N, H, W, C, 2, 2).transpose(0, 1, 4, 2, 5, 3).reshape(N, 2 * H, 2 * W, C)
    mean = ps.mean(axis=(0, 1, 2), keepdims=True)
    var = ps.var(axis=(0, 1, 2), keepdims=True)          # biased, like torch BN forward
    out = (ps - mean) / jnp.sqrt(var + 1e-5) * gamma + beta
    return jnp.transpose(out, (0, 3, 1, 2))


if __name__ == "__main__":
    in_channels, out_channels = 4, 8
    N, H, W = 2, 16, 16

    key = jax.random.PRNGKey(0)
    kx, kw, kg, kb = jax.random.split(key, 4)

    # Deterministic synthetic parameters (shapes from the module's __init__):
    #   conv.weight: (out_channels*4, in_channels, 3, 3), no bias; bn.weight/bias: (out_channels,)
    x = jax.random.normal(kx, (N, in_channels, H, W), jnp.float32)
    w_oihw = 0.1 * jax.random.normal(kw, (out_channels * 4, in_channels, 3, 3), jnp.float32)
    gamma = 1.0 + 0.1 * jax.random.normal(kg, (out_channels,), jnp.float32)
    beta = 0.1 * jax.random.normal(kb, (out_channels,), jnp.float32)

    out = pixel_shuffle_block(x, w_oihw, gamma, beta, out_channels=out_channels)
    out = jax.block_until_ready(out)

    ref = reference(x, w_oihw, gamma, beta, out_channels)
    assert out.shape == (N, out_channels, 2 * H, 2 * W), out.shape
    err = float(jnp.max(jnp.abs(out - ref)))
    assert np.isfinite(err) and err < 5e-2, f"mismatch vs reference: {err}"

    print("KERNEL_OK")
</pallas_src>

<mosaic_0001>
module attributes {stable_mosaic.version = 11 : i64} {
  func.func @conv_ps_stats_kernel(%arg0: i32, %arg1: memref<32x256xbf16, #tpu.memory_space<vmem>>, %arg2: memref<256x512xbf16, #tpu.memory_space<vmem>>, %arg3: memref<512x128xf32, #tpu.memory_space<vmem>>, %arg4: memref<2x8x16x64xbf16, #tpu.memory_space<vmem>>, %arg5: memref<1x128xf32, #tpu.memory_space<vmem>>, %arg6: memref<1x128xf32, #tpu.memory_space<vmem>>) attributes {dimension_semantics = [#tpu.dimension_semantics<arbitrary>], iteration_bounds = array<i64: 1>, scalar_prefetch = 0 : i64, scratch_operands = 0 : i64, tpu.core_type = #tpu.core_type<tc>, window_params = [{transform_indices = @transform_0, window_bounds = array<i64: 32, 256>}, {pipeline_mode = #tpu.pipeline_mode<synchronous>, transform_indices = @transform_1, window_bounds = array<i64: 256, 512>}, {pipeline_mode = #tpu.pipeline_mode<synchronous>, transform_indices = @transform_2, window_bounds = array<i64: 512, 128>}, {transform_indices = @transform_3, window_bounds = array<i64: 2, 8, 16, 64>}, {pipeline_mode = #tpu.pipeline_mode<synchronous>, transform_indices = @transform_4, window_bounds = array<i64: 1, 128>}, {pipeline_mode = #tpu.pipeline_mode<synchronous>, transform_indices = @transform_5, window_bounds = array<i64: 1, 128>}]} {
    %c0 = arith.constant 0 : index
    %c0_0 = arith.constant 0 : index
    %0 = vector.load %arg1[%c0, %c0_0] : memref<32x256xbf16, #tpu.memory_space<vmem>>, vector<32x256xbf16>
    %c0_1 = arith.constant 0 : index
    %c0_2 = arith.constant 0 : index
    %1 = vector.load %arg2[%c0_1, %c0_2] : memref<256x512xbf16, #tpu.memory_space<vmem>>, vector<256x512xbf16>
    %cst = arith.constant dense<0.000000e+00> : vector<32x512xf32>
    %2 = tpu.matmul %0, %1, %cst {dimension_numbers = #tpu.dot_dimension_numbers<[1], [0], [0], [1], [0, 0, 1, 1], [], []>} : vector<32x256xbf16>, vector<256x512xbf16>, vector<32x512xf32> -> vector<32x512xf32>
    %3 = vector.shape_cast %2 : vector<32x512xf32> to vector<2x16x512xf32>
    %4 = vector.extract_strided_slice %3 {offsets = [0, 0, 0], sizes = [2, 16, 64], strides = [1, 1, 1]} : vector<2x16x512xf32> to vector<2x16x64xf32>
    %5 = arith.truncf %4 : vector<2x16x64xf32> to vector<2x16x64xbf16>
    %c0_3 = arith.constant 0 : index
    %c0_4 = arith.constant 0 : index
    %c0_5 = arith.constant 0 : index
    %c0_6 = arith.constant 0 : index
    %6 = vector.load %arg4[%c0_3, %c0_4, %c0_5, %c0_6] : memref<2x8x16x64xbf16, #tpu.memory_space<vmem>>, vector<2x1x16x64xbf16>
    %7 = vector.shape_cast %6 : vector<2x1x16x64xbf16> to vector<2x16x64xbf16>
    %8 = vector.shape_cast %5 : vector<2x16x64xbf16> to vector<2x1x16x64xbf16>
    tpu.vector_store %arg4[%c0_3, %c0_4, %c0_5, %c0_6], %8 {strides = array<i32>} : memref<2x8x16x64xbf16, #tpu.memory_space<vmem>>, vector<2x1x16x64xbf16>,
    %9 = vector.extract_strided_slice %3 {offsets = [0, 0, 64], sizes = [2, 16, 64], strides = [1, 1, 1]} : vector<2x16x512xf32> to vector<2x16x64xf32>
    %10 = arith.truncf %9 : vector<2x16x64xf32> to vector<2x16x64xbf16>
    %c0_7 = arith.constant 0 : index
    %c1 = arith.constant 1 : index
    %c0_8 = arith.constant 0 : index
    %c0_9 = arith.constant 0 : index
    %11 = vector.load %arg4[%c0_7, %c1, %c0_8, %c0_9] : memref<2x8x16x64xbf16, #tpu.memory_space<vmem>>, vector<2x1x16x64xbf16>
    %12 = vector.shape_cast %11 : vector<2x1x16x64xbf16> to vector<2x16x64xbf16>
    %13 = vector.shape_cast %10 : vector<2x16x64xbf16> to vector<2x1x16x64xbf16>
    tpu.vector_store %arg4[%c0_7, %c1, %c0_8, %c0_9], %13 {strides = array<i32>} : memref<2x8x16x64xbf16, #tpu.memory_space<vmem>>, vector<2x1x16x64xbf16>,
    %14 = vector.extract_strided_slice %3 {offsets = [0, 0, 128], sizes = [2, 16, 64], strides = [1, 1, 1]} : vector<2x16x512xf32> to vector<2x16x64xf32>
    %15 = arith.truncf %14 : vector<2x16x64xf32> to vector<2x16x64xbf16>
    %c0_10 = arith.constant 0 : index
    %c2 = arith.constant 2 : index
    %c0_11 = arith.constant 0 : index
    %c0_12 = arith.constant 0 : index
    %16 = vector.load %arg4[%c0_10, %c2, %c0_11, %c0_12] : memref<2x8x16x64xbf16, #tpu.memory_space<vmem>>, vector<2x1x16x64xbf16>
    %17 = vector.shape_cast %16 : vector<2x1x16x64xbf16> to vector<2x16x64xbf16>
    %18 = vector.shape_cast %15 : vector<2x16x64xbf16> to vector<2x1x16x64xbf16>
    tpu.vector_store %arg4[%c0_10, %c2, %c0_11, %c0_12], %18 {strides = array<i32>} : memref<2x8x16x64xbf16, #tpu.memory_space<vmem>>, vector<2x1x16x64xbf16>,
    %19 = vector.extract_strided_slice %3 {offsets = [0, 0, 192], sizes = [2, 16, 64], strides = [1, 1, 1]} : vector<2x16x512xf32> to vector<2x16x64xf32>
    %20 = arith.truncf %19 : vector<2x16x64xf32> to vector<2x16x64xbf16>
    %c0_13 = arith.constant 0 : index
    %c3 = arith.constant 3 : index
    %c0_14 = arith.constant 0 : index
    %c0_15 = arith.constant 0 : index
    %21 = vector.load %arg4[%c0_13, %c3, %c0_14, %c0_15] : memref<2x8x16x64xbf16, #tpu.memory_space<vmem>>, vector<2x1x16x64xbf16>
    %22 = vector.shape_cast %21 : vector<2x1x16x64xbf16> to vector<2x16x64xbf16>
    %23 = vector.shape_cast %20 : vector<2x16x64xbf16> to vector<2x1x16x64xbf16>
    tpu.vector_store %arg4[%c0_13, %c3, %c0_14, %c0_15], %23 {strides = array<i32>} : memref<2x8x16x64xbf16, #tpu.memory_space<vmem>>, vector<2x1x16x64xbf16>,
    %24 = vector.extract_strided_slice %3 {offsets = [0, 0, 256], sizes = [2, 16, 64], strides = [1, 1, 1]} : vector<2x16x512xf32> to vector<2x16x64xf32>
    %25 = arith.truncf %24 : vector<2x16x64xf32> to vector<2x16x64xbf16>
    %c0_16 = arith.constant 0 : index
    %c4 = arith.constant 4 : index
    %c0_17 = arith.constant 0 : index
    %c0_18 = arith.constant 0 : index
    %26 = vector.load %arg4[%c0_16, %c4, %c0_17, %c0_18] : memref<2x8x16x64xbf16, #tpu.memory_space<vmem>>, vector<2x1x16x64xbf16>
    %27 = vector.shape_cast %26 : vector<2x1x16x64xbf16> to vector<2x16x64xbf16>
    %28 = vector.shape_cast %25 : vector<2x16x64xbf16> to vector<2x1x16x64xbf16>
    tpu.vector_store %arg4[%c0_16, %c4, %c0_17, %c0_18], %28 {strides = array<i32>} : memref<2x8x16x64xbf16, #tpu.memory_space<vmem>>, vector<2x1x16x64xbf16>,
    %29 = vector.extract_strided_slice %3 {offsets = [0, 0, 320], sizes = [2, 16, 64], strides = [1, 1, 1]} : vector<2x16x512xf32> to vector<2x16x64xf32>
    %30 = arith.truncf %29 : vector<2x16x64xf32> to vector<2x16x64xbf16>
    %c0_19 = arith.constant 0 : index
    %c5 = arith.constant 5 : index
    %c0_20 = arith.constant 0 : index
    %c0_21 = arith.constant 0 : index
    %31 = vector.load %arg4[%c0_19, %c5, %c0_20, %c0_21] : memref<2x8x16x64xbf16, #tpu.memory_space<vmem>>, vector<2x1x16x64xbf16>
    %32 = vector.shape_cast %31 : vector<2x1x16x64xbf16> to vector<2x16x64xbf16>
    %33 = vector.shape_cast %30 : vector<2x16x64xbf16> to vector<2x1x16x64xbf16>
    tpu.vector_store %arg4[%c0_19, %c5, %c0_20, %c0_21], %33 {strides = array<i32>} : memref<2x8x16x64xbf16, #tpu.memory_space<vmem>>, vector<2x1x16x64xbf16>,
    %34 = vector.extract_strided_slice %3 {offsets = [0, 0, 384], sizes = [2, 16, 64], strides = [1, 1, 1]} : vector<2x16x512xf32> to vector<2x16x64xf32>
    %35 = arith.truncf %34 : vector<2x16x64xf32> to vector<2x16x64xbf16>
    %c0_22 = arith.constant 0 : index
    %c6 = arith.constant 6 : index
    %c0_23 = arith.constant 0 : index
    %c0_24 = arith.constant 0 : index
    %36 = vector.load %arg4[%c0_22, %c6, %c0_23, %c0_24] : memref<2x8x16x64xbf16, #tpu.memory_space<vmem>>, vector<2x1x16x64xbf16>
    %37 = vector.shape_cast %36 : vector<2x1x16x64xbf16> to vector<2x16x64xbf16>
    %38 = vector.shape_cast %35 : vector<2x16x64xbf16> to vector<2x1x16x64xbf16>
    tpu.vector_store %arg4[%c0_22, %c6, %c0_23, %c0_24], %38 {strides = array<i32>} : memref<2x8x16x64xbf16, #tpu.memory_space<vmem>>, vector<2x1x16x64xbf16>,
    %39 = vector.extract_strided_slice %3 {offsets = [0, 0, 448], sizes = [2, 16, 64], strides = [1, 1, 1]} : vector<2x16x512xf32> to vector<2x16x64xf32>
    %40 = arith.truncf %39 : vector<2x16x64xf32> to vector<2x16x64xbf16>
    %c0_25 = arith.constant 0 : index
    %c7 = arith.constant 7 : index
    %c0_26 = arith.constant 0 : index
    %c0_27 = arith.constant 0 : index
    %41 = vector.load %arg4[%c0_25, %c7, %c0_26, %c0_27] : memref<2x8x16x64xbf16, #tpu.memory_space<vmem>>, vector<2x1x16x64xbf16>
    %42 = vector.shape_cast %41 : vector<2x1x16x64xbf16> to vector<2x16x64xbf16>
    %43 = vector.shape_cast %40 : vector<2x16x64xbf16> to vector<2x1x16x64xbf16>
    tpu.vector_store %arg4[%c0_25, %c7, %c0_26, %c0_27], %43 {strides = array<i32>} : memref<2x8x16x64xbf16, #tpu.memory_space<vmem>>, vector<2x1x16x64xbf16>,
    %cst_28 = arith.constant dense<0.000000e+00> : vector<512xf32>
    %44 = vector.multi_reduction <add>, %2, %cst_28 [0] : vector<32x512xf32> to vector<512xf32>
    %45 = vector.shape_cast %44 : vector<512xf32> to vector<1x512xf32>
    %46 = arith.mulf %2, %2 : vector<32x512xf32>
    %cst_29 = arith.constant dense<0.000000e+00> : vector<512xf32>
    %47 = vector.multi_reduction <add>, %46, %cst_29 [0] : vector<32x512xf32> to vector<512xf32>
    %48 = vector.shape_cast %47 : vector<512xf32> to vector<1x512xf32>
    %c0_i32 = arith.constant 0 : i32
    %49 = arith.cmpi eq, %arg0, %c0_i32 : i32
    %50 = arith.extui %49 : i1 to i32
    %c0_i32_30 = arith.constant 0 : i32
    %51 = arith.cmpi ne, %50, %c0_i32_30 : i32
    scf.if %51 {
      %cst_45 = arith.constant 0.000000e+00 : f32
      %62 = vector.broadcast %cst_45 : f32 to vector<1x128xf32>
      %c0_46 = arith.constant 0 : index
      %c0_47 = arith.constant 0 : index
      %63 = vector.load %arg5[%c0_46, %c0_47] : memref<1x128xf32, #tpu.memory_space<vmem>>, vector<1x128xf32>
      tpu.vector_store %arg5[%c0_46, %c0_47], %62 {strides = array<i32>} : memref<1x128xf32, #tpu.memory_space<vmem>>, vector<1x128xf32>,
      %cst_48 = arith.constant 0.000000e+00 : f32
      %64 = vector.broadcast %cst_48 : f32 to vector<1x128xf32>
      %c0_49 = arith.constant 0 : index
      %c0_50 = arith.constant 0 : index
      %65 = vector.load %arg6[%c0_49, %c0_50] : memref<1x128xf32, #tpu.memory_space<vmem>>, vector<1x128xf32>
      tpu.vector_store %arg6[%c0_49, %c0_50], %64 {strides = array<i32>} : memref<1x128xf32, #tpu.memory_space<vmem>>, vector<1x128xf32>,
    } else {
    }
    %c0_31 = arith.constant 0 : index
    %c0_32 = arith.constant 0 : index
    %52 = vector.load %arg5[%c0_31, %c0_32] : memref<1x128xf32, #tpu.memory_space<vmem>>, vector<1x128xf32>
    %c0_33 = arith.constant 0 : index
    %c0_34 = arith.constant 0 : index
    %53 = vector.load %arg3[%c0_33, %c0_34] : memref<512x128xf32, #tpu.memory_space<vmem>>, vector<512x128xf32>
    %cst_35 = arith.constant dense<0.000000e+00> : vector<1x128xf32>
    %54 = tpu.matmul %45, %53, %cst_35 {dimension_numbers = #tpu.dot_dimension_numbers<[1], [0], [0], [1], [0, 0, 1, 1], [], []>} : vector<1x512xf32>, vector<512x128xf32>, vector<1x128xf32> -> vector<1x128xf32>
    %55 = arith.addf %52, %54 : vector<1x128xf32>
    %c0_36 = arith.constant 0 : index
    %c0_37 = arith.constant 0 : index
    %56 = vector.load %arg5[%c0_36, %c0_37] : memref<1x128xf32, #tpu.memory_space<vmem>>, vector<1x128xf32>
    tpu.vector_store %arg5[%c0_36, %c0_37], %55 {strides = array<i32>} : memref<1x128xf32, #tpu.memory_space<vmem>>, vector<1x128xf32>,
    %c0_38 = arith.constant 0 : index
    %c0_39 = arith.constant 0 : index
    %57 = vector.load %arg6[%c0_38, %c0_39] : memref<1x128xf32, #tpu.memory_space<vmem>>, vector<1x128xf32>
    %c0_40 = arith.constant 0 : index
    %c0_41 = arith.constant 0 : index
    %58 = vector.load %arg3[%c0_40, %c0_41] : memref<512x128xf32, #tpu.memory_space<vmem>>, vector<512x128xf32>
    %cst_42 = arith.constant dense<0.000000e+00> : vector<1x128xf32>
    %59 = tpu.matmul %48, %58, %cst_42 {dimension_numbers = #tpu.dot_dimension_numbers<[1], [0], [0], [1], [0, 0, 1, 1], [], []>} : vector<1x512xf32>, vector<512x128xf32>, vector<1x128xf32> -> vector<1x128xf32>
    %60 = arith.addf %57, %59 : vector<1x128xf32>
    %c0_43 = arith.constant 0 : index
    %c0_44 = arith.constant 0 : index
    %61 = vector.load %arg6[%c0_43, %c0_44] : memref<1x128xf32, #tpu.memory_space<vmem>>, vector<1x128xf32>
    tpu.vector_store %arg6[%c0_43, %c0_44], %60 {strides = array<i32>} : memref<1x128xf32, #tpu.memory_space<vmem>>, vector<1x128xf32>,
    return
  }
  func.func @transform_0(%arg0: i32) -> (i32, i32) {
    %c0_i32 = arith.constant 0 : i32
    %c0_i32_0 = arith.constant 0 : i32
    return %arg0, %c0_i32 : i32, i32
  }
  func.func @transform_1(%arg0: i32) -> (i32, i32) {
    %c0_i32 = arith.constant 0 : i32
    %c0_i32_0 = arith.constant 0 : i32
    %c0_i32_1 = arith.constant 0 : i32
    return %c0_i32, %c0_i32_0 : i32, i32
  }
  func.func @transform_2(%arg0: i32) -> (i32, i32) {
    %c0_i32 = arith.constant 0 : i32
    %c0_i32_0 = arith.constant 0 : i32
    %c0_i32_1 = arith.constant 0 : i32
    return %c0_i32, %c0_i32_0 : i32, i32
  }
  func.func @transform_3(%arg0: i32) -> (i32, i32, i32, i32) {
    %c0_i32 = arith.constant 0 : i32
    %c0_i32_0 = arith.constant 0 : i32
    %c0_i32_1 = arith.constant 0 : i32
    %c0_i32_2 = arith.constant 0 : i32
    return %arg0, %c0_i32, %c0_i32_0, %c0_i32_1 : i32, i32, i32, i32
  }
  func.func @transform_4(%arg0: i32) -> (i32, i32) {
    %c0_i32 = arith.constant 0 : i32
    %c0_i32_0 = arith.constant 0 : i32
    %c0_i32_1 = arith.constant 0 : i32
    return %c0_i32, %c0_i32_0 : i32, i32
  }
  func.func @transform_5(%arg0: i32) -> (i32, i32) {
    %c0_i32 = arith.constant 0 : i32
    %c0_i32_0 = arith.constant 0 : i32
    %c0_i32_1 = arith.constant 0 : i32
    return %c0_i32, %c0_i32_0 : i32, i32
  }
}

module attributes {stable_mosaic.version = 11 : i64} {
  func.func @bn_apply_kernel(%arg0: i32, %arg1: memref<2x8x1024xbf16, #tpu.memory_space<vmem>>, %arg2: memref<8x1xf32, #tpu.memory_space<vmem>>, %arg3: memref<8x1xf32, #tpu.memory_space<vmem>>, %arg4: memref<2x8x1024xf32, #tpu.memory_space<vmem>>) attributes {dimension_semantics = [#tpu.dimension_semantics<parallel>], iteration_bounds = array<i64: 1>, scalar_prefetch = 0 : i64, scratch_operands = 0 : i64, tpu.core_type = #tpu.core_type<tc>, window_params = [{transform_indices = @transform_0, window_bounds = array<i64: 2, 8, 1024>}, {pipeline_mode = #tpu.pipeline_mode<synchronous>, transform_indices = @transform_1, window_bounds = array<i64: 8, 1>}, {pipeline_mode = #tpu.pipeline_mode<synchronous>, transform_indices = @transform_2, window_bounds = array<i64: 8, 1>}, {transform_indices = @transform_3, window_bounds = array<i64: 2, 8, 1024>}]} {
    %c0 = arith.constant 0 : index
    %c0_0 = arith.constant 0 : index
    %c0_1 = arith.constant 0 : index
    %0 = vector.load %arg1[%c0, %c0_0, %c0_1] : memref<2x8x1024xbf16, #tpu.memory_space<vmem>>, vector<2x8x1024xbf16>
    %1 = arith.extf %0 : vector<2x8x1024xbf16> to vector<2x8x1024xf32>
    %c0_2 = arith.constant 0 : index
    %c0_3 = arith.constant 0 : index
    %2 = vector.load %arg2[%c0_2, %c0_3] : memref<8x1xf32, #tpu.memory_space<vmem>>, vector<8x1xf32>
    %3 = vector.shape_cast %2 : vector<8x1xf32> to vector<1x8x1xf32>
    %4 = vector.broadcast %3 : vector<1x8x1xf32> to vector<2x8x1024xf32>
    %5 = arith.mulf %1, %4 : vector<2x8x1024xf32>
    %c0_4 = arith.constant 0 : index
    %c0_5 = arith.constant 0 : index
    %6 = vector.load %arg3[%c0_4, %c0_5] : memref<8x1xf32, #tpu.memory_space<vmem>>, vector<8x1xf32>
    %7 = vector.shape_cast %6 : vector<8x1xf32> to vector<1x8x1xf32>
    %8 = vector.broadcast %7 : vector<1x8x1xf32> to vector<2x8x1024xf32>
    %9 = arith.addf %5, %8 : vector<2x8x1024xf32>
    %c0_6 = arith.constant 0 : index
    %c0_7 = arith.constant 0 : index
    %c0_8 = arith.constant 0 : index
    %10 = vector.load %arg4[%c0_6, %c0_7, %c0_8] : memref<2x8x1024xf32, #tpu.memory_space<vmem>>, vector<2x8x1024xf32>
    tpu.vector_store %arg4[%c0_6, %c0_7, %c0_8], %9 {strides = array<i32>} : memref<2x8x1024xf32, #tpu.memory_space<vmem>>, vector<2x8x1024xf32>,
    return
  }
  func.func @transform_0(%arg0: i32) -> (i32, i32, i32) {
    %c0_i32 = arith.constant 0 : i32
    %c0_i32_0 = arith.constant 0 : i32
    %c0_i32_1 = arith.constant 0 : i32
    return %arg0, %c0_i32, %c0_i32_0 : i32, i32, i32
  }
  func.func @transform_1(%arg0: i32) -> (i32, i32) {
    %c0_i32 = arith.constant 0 : i32
    %c0_i32_0 = arith.constant 0 : i32
    %c0_i32_1 = arith.constant 0 : i32
    return %c0_i32, %c0_i32_0 : i32, i32
  }
  func.func @transform_2(%arg0: i32) -> (i32, i32) {
    %c0_i32 = arith.constant 0 : i32
    %c0_i32_0 = arith.constant 0 : i32
    %c0_i32_1 = arith.constant 0 : i32
    return %c0_i32, %c0_i32_0 : i32, i32
  }
  func.func @transform_3(%arg0: i32) -> (i32, i32, i32) {
    %c0_i32 = arith.constant 0 : i32
    %c0_i32_0 = arith.constant 0 : i32
    %c0_i32_1 = arith.constant 0 : i32
    return %arg0, %c0_i32, %c0_i32_0 : i32, i32, i32
  }
}

</mosaic_0001>

<bundles_post_ra>
// kernel: pixel_shuffle_block.2
= control target key start
LH: loop header
LB: loop body
LE: loop exit
PB: predicated region body
PF: predicated region fallthrough
CT: control target
= control target key end

     0   :  { %vm581_vm0 = vcmask 519168   ;;  %s1467_s24 = smov 64   ;;  %s2576_s1 = inlined_call_operand.vmem [shape: bf16[256,512], index: 1, kind: input, shape index: {}]   ;;  %s2577_s0 = inlined_call_operand.vmem [shape: bf16[32,256], index: 0, kind: input, shape index: {}]   ;;  %s2578_s2 = inlined_call_operand.vmem [shape: f32[512,128], index: 2, kind: input, shape index: {}]   ;;  %s2579_s3 = inlined_call_operand.vmem [shape: bf16[2,8,16,64], index: 3, kind: output, shape index: {0}]   ;;  %s2580_s4 = inlined_call_operand.vmem [shape: f32[1,128], index: 4, kind: output, shape index: {1}]   ;;  %s2581_s5 = inlined_call_operand.vmem [shape: f32[1,128], index: 5, kind: output, shape index: {2}]  }
   0x1   :  { %v1227_v0 = vld [vmem:[%s2576_s1 + $0xe0] sm:$0xf]  ;;  %v1431_v1 = vld [vmem:[%s2576_s1 + $0xec] sm:$0xf0]  ;;  %v1429_v5 = vld [vmem:[%s2576_s1 + $0xe4] sm:$0xf] }
   0x2   :  { %v1355_v2 = vld [vmem:[%s2576_s1 + $0x1e0] sm:$0xf]  ;;  %v1228_v3 = vor.u32 %v1431_v1, %v1227_v0  ;;  %v1463_v4 = vld [vmem:[%s2576_s1 + $0x1ec] sm:$0xf0]  ;;  %v1229_v6 = vld [vmem:[%s2576_s1 + $0xf0] sm:$0xf0] }
   0x3   :  { %v1356_v7 = vor.u32 %v1463_v4, %v1355_v2  ;;  %v1232_v8 = vor.u32 %v1429_v5, %v1229_v6  ;;  %v1461_v9 = vld [vmem:[%s2576_s1 + $0x1e4] sm:$0xf]  ;;  %v1357_v10 = vld [vmem:[%s2576_s1 + $0x1f0] sm:$0xf0]  ;;  %v1211_v11 = vld [vmem:[%s2576_s1 + $0xc0] sm:$0xf] }
   0x4   :  { %425 = vmatpush.bf16.msra.mxu0 %v1228_v3  ;;  %v1360_v12 = vor.u32 %v1461_v9, %v1357_v10  ;;  %v1427_v13 = vld [vmem:[%s2576_s1 + $0xcc] sm:$0xf0]  ;;  %v1339_v14 = vld [vmem:[%s2576_s1 + $0x1c0] sm:$0xf]  ;;  %v1425_v18 = vld [vmem:[%s2576_s1 + $0xc4] sm:$0xf] }
   0x5   :  { %v1459_v15 = vld [vmem:[%s2576_s1 + $0x1cc] sm:$0xf0]  ;;  %444 = vmatpush.bf16.msra.mxu1 %v1356_v7  ;;  %463 = vmatpush.bf16.msra.mxu2 %v1232_v8  ;;  %v1212_v16 = vor.u32 %v1427_v13, %v1211_v11  ;;  %v1213_v19 = vld [vmem:[%s2576_s1 + $0xd0] sm:$0xf0]  ;;  %v1457_v20 = vld [vmem:[%s2576_s1 + $0x1c4] sm:$0xf] }
   0x6   :  { %v1340_v17 = vor.u32 %v1459_v15, %v1339_v14  ;;  %482 = vmatpush.bf16.msra.mxu3 %v1360_v12  ;;  %v1216_v21 = vor.u32 %v1425_v18, %v1213_v19  ;;  %v1341_v22 = vld [vmem:[%s2576_s1 + $0x1d0] sm:$0xf0]  ;;  %v1195_v23 = vld [vmem:[%s2576_s1 + $0xa0] sm:$0xf]  ;;  %v1423_v24 = vld [vmem:[%s2576_s1 + $0xac] sm:$0xf0] }
   0x7   :  { %v1344_v25 = vor.u32 %v1457_v20, %v1341_v22  ;;  %v1323_v26 = vld [vmem:[%s2576_s1 + $0x1a0] sm:$0xf]  ;;  %v1455_v27 = vld [vmem:[%s2576_s1 + $0x1ac] sm:$0xf0]  ;;  %v1421_v28 = vld [vmem:[%s2576_s1 + $0xa4] sm:$0xf]  ;;  %v1196_v29 = vor.u32 %v1423_v24, %v1195_v23 }
   0x8   :  { %426 = vmatpush.bf16.msra.mxu0 %v1212_v16  ;;  %v1197_v30 = vld [vmem:[%s2576_s1 + $0xb0] sm:$0xf0]  ;;  %v1453_v31 = vld [vmem:[%s2576_s1 + $0x1a4] sm:$0xf]  ;;  %v1324_v33 = vor.u32 %v1455_v27, %v1323_v26  ;;  %v1179_v35 = vld [vmem:[%s2576_s1 + $0x80] sm:$0xf] }
   0x9   :  { %v1325_v32 = vld [vmem:[%s2576_s1 + $0x1b0] sm:$0xf0]  ;;  %445 = vmatpush.bf16.msra.mxu1 %v1340_v17  ;;  %464 = vmatpush.bf16.msra.mxu2 %v1216_v21  ;;  %v1200_v34 = vor.u32 %v1421_v28, %v1197_v30  ;;  %v1419_v36 = vld [vmem:[%s2576_s1 + $0x8c] sm:$0xf0]  ;;  %v1307_v37 = vld [vmem:[%s2576_s1 + $0x180] sm:$0xf] }
   0xa   :  { %483 = vmatpush.bf16.msra.mxu3 %v1344_v25  ;;  %v1328_v38 = vor.u32 %v1453_v31, %v1325_v32  ;;  %v1451_v39 = vld [vmem:[%s2576_s1 + $0x18c] sm:$0xf0]  ;;  %v1417_v40 = vld [vmem:[%s2576_s1 + $0x84] sm:$0xf]  ;;  %v1181_v41 = vld [vmem:[%s2576_s1 + $0x90] sm:$0xf0]  ;;  %v1180_v44 = vor.u32 %v1419_v36, %v1179_v35 }
   0xb   :  { %v1449_v42 = vld [vmem:[%s2576_s1 + $0x184] sm:$0xf]  ;;  %v1309_v43 = vld [vmem:[%s2576_s1 + $0x190] sm:$0xf0]  ;;  %v1308_v45 = vor.u32 %v1451_v39, %v1307_v37  ;;  %v1184_v46 = vor.u32 %v1417_v40, %v1181_v41  ;;  %v1163_v47 = vld [vmem:[%s2576_s1 + $0x60] sm:$0xf] }
   0xc   :  { %427 = vmatpush.bf16.msra.mxu0 %v1196_v29  ;;  %v1415_v48 = vld [vmem:[%s2576_s1 + $0x6c] sm:$0xf0]  ;;  %v1291_v49 = vld [vmem:[%s2576_s1 + $0x160] sm:$0xf]  ;;  %v1312_v50 = vor.u32 %v1449_v42, %v1309_v43  ;;  %v1413_v52 = vld [vmem:[%s2576_s1 + $0x64] sm:$0xf] }
   0xd   :  { %446 = vmatpush.bf16.msra.mxu1 %v1324_v33  ;;  %465 = vmatpush.bf16.msra.mxu2 %v1200_v34  ;;  %v1447_v51 = vld [vmem:[%s2576_s1 + $0x16c] sm:$0xf0]  ;;  %v1165_v53 = vld [vmem:[%s2576_s1 + $0x70] sm:$0xf0]  ;;  %v1445_v54 = vld [vmem:[%s2576_s1 + $0x164] sm:$0xf]  ;;  %v1164_v56 = vor.u32 %v1415_v48, %v1163_v47 }
   0xe   :  { %484 = vmatpush.bf16.msra.mxu3 %v1328_v38  ;;  %v1293_v55 = vld [vmem:[%s2576_s1 + $0x170] sm:$0xf0]  ;;  %v1292_v57 = vor.u32 %v1447_v51, %v1291_v49  ;;  %v1168_v58 = vor.u32 %v1413_v52, %v1165_v53  ;;  %v1147_v59 = vld [vmem:[%s2576_s1 + $0x40] sm:$0xf]  ;;  %v1411_v60 = vld [vmem:[%s2576_s1 + $0x4c] sm:$0xf0] }
   0xf   :  { %v1275_v61 = vld [vmem:[%s2576_s1 + $0x140] sm:$0xf]  ;;  %v1296_v62 = vor.u32 %v1445_v54, %v1293_v55  ;;  %v1443_v63 = vld [vmem:[%s2576_s1 + $0x14c] sm:$0xf0]  ;;  %v1409_v0 = vld [vmem:[%s2576_s1 + $0x44] sm:$0xf]  ;;  %v1148_v4 = vor.u32 %v1411_v60, %v1147_v59 }
  0x10   :  { %428 = vmatpush.bf16.msra.mxu0 %v1180_v44  ;;  %v1149_v1 = vld [vmem:[%s2576_s1 + $0x50] sm:$0xf0]  ;;  %v1441_v2 = vld [vmem:[%s2576_s1 + $0x144] sm:$0xf]  ;;  %v1276_v5 = vor.u32 %v1443_v63, %v1275_v61  ;;  %v1131_v7 = vld [vmem:[%s2576_s1 + $0x20] sm:$0xf] }
  0x11   :  { %447 = vmatpush.bf16.msra.mxu1 %v1308_v45  ;;  %466 = vmatpush.bf16.msra.mxu2 %v1184_v46  ;;  %v1277_v3 = vld [vmem:[%s2576_s1 + $0x150] sm:$0xf0]  ;;  %v1152_v6 = vor.u32 %v1409_v0, %v1149_v1  ;;  %v1407_v8 = vld [vmem:[%s2576_s1 + $0x2c] sm:$0xf0]  ;;  %v1259_v9 = vld [vmem:[%s2576_s1 + $0x120] sm:$0xf] }
  0x12   :  { %485 = vmatpush.bf16.msra.mxu3 %v1312_v50  ;;  %v1280_v10 = vor.u32 %v1441_v2, %v1277_v3  ;;  %v1439_v11 = vld [vmem:[%s2576_s1 + $0x12c] sm:$0xf0]  ;;  %v1405_v12 = vld [vmem:[%s2576_s1 + $0x24] sm:$0xf]  ;;  %v1133_v13 = vld [vmem:[%s2576_s1 + $0x30] sm:$0xf0]  ;;  %v1132_v16 = vor.u32 %v1407_v8, %v1131_v7 }
  0x13   :  { %v1437_v14 = vld [vmem:[%s2576_s1 + $0x124] sm:$0xf]  ;;  %v1261_v15 = vld [vmem:[%s2576_s1 + $0x130] sm:$0xf0]  ;;  %v1115_v17 = vld [vmem:[%s2576_s1] sm:$0xf]  ;;  %v1260_v19 = vor.u32 %v1439_v11, %v1259_v9  ;;  %v1136_v20 = vor.u32 %v1405_v12, %v1133_v13 }
  0x14   :  { %429 = vmatpush.bf16.msra.mxu0 %v1164_v56  ;;  %v1403_v18 = vld [vmem:[%s2576_s1 + $0xc] sm:$0xf0]  ;;  %v1243_v21 = vld [vmem:[%s2576_s1 + $0x100] sm:$0xf]  ;;  %v1401_v23 = vld [vmem:[%s2576_s1 + $0x4] sm:$0xf]  ;;  %v1264_v24 = vor.u32 %v1437_v14, %v1261_v15 }
  0x15   :  { %448 = vmatpush.bf16.msra.mxu1 %v1292_v57  ;;  %467 = vmatpush.bf16.msra.mxu2 %v1168_v58  ;;  %v1435_v22 = vld [vmem:[%s2576_s1 + $0x10c] sm:$0xf0]  ;;  %v1117_v25 = vld [vmem:[%s2576_s1 + $0x10] sm:$0xf0]  ;;  %v1433_v26 = vld [vmem:[%s2576_s1 + $0x104] sm:$0xf]  ;;  %v1116_v31 = vor.u32 %v1403_v18, %v1115_v17 }
  0x16   :  { %486 = vmatpush.bf16.msra.mxu3 %v1296_v62  ;;  %v1245_v27 = vld [vmem:[%s2576_s1 + $0x110] sm:$0xf0]  ;;  %v1099_v28 = vld [vmem:[%s2577_s0] sm:$0xf]  ;;  %v1430_v29 = vld [vmem:[%s2576_s1 + $0xec] sm:$0xf]  ;;  %v1244_v35 = vor.u32 %v1435_v22, %v1243_v21  ;;  %v1120_v36 = vor.u32 %v1401_v23, %v1117_v25 }
  0x17   :  { %v1237_v30 = vld [vmem:[%s2576_s1 + $0xf8] sm:$0xf0]  ;;  %v1398_v32 = vld [vmem:[%s2577_s0 + $0x4] sm:$0xf0]  ;;  %v1462_v33 = vld [vmem:[%s2576_s1 + $0x1ec] sm:$0xf]  ;;  %v1248_v39 = vor.u32 %v1433_v26, %v1245_v27 }
  0x18   :  { %430 = vmatpush.bf16.msra.mxu0 %v1148_v4  ;;  %v1365_v34 = vld [vmem:[%s2576_s1 + $0x1f8] sm:$0xf0]  ;;  %v1397_v37 = vld [vmem:[%s2577_s0 + $0x4] sm:$0xf]  ;;  %v1101_v38 = vld [vmem:[%s2577_s0 + $0x8] sm:$0xf0]  ;;  %v1240_v40 = vor.u32 %v1430_v29, %v1237_v30  ;;  %v1724_v44 = vor.u32 %v1398_v32, %v1099_v28 }
  0x19   :  { %449 = vmatpush.bf16.msra.mxu1 %v1276_v5  ;;  %468 = vmatpush.bf16.msra.mxu2 %v1152_v6  ;;  %v1235_v41 = vld [vmem:[%s2576_s1 + $0xe8] sm:$0xf]  ;;  %v1432_v42 = vld [vmem:[%s2576_s1 + $0xf4] sm:$0xf0]  ;;  %v1368_v45 = vor.u32 %v1462_v33, %v1365_v34  ;;  %v1426_v47 = vld [vmem:[%s2576_s1 + $0xcc] sm:$0xf]  ;;  %v1735_v49 = vor.u32 %v1397_v37, %v1101_v38 }
  0x1a   :  { %487 = vmatpush.bf16.msra.mxu3 %v1280_v10  ;;  %v1363_v43 = vld [vmem:[%s2576_s1 + $0x1e8] sm:$0xf]  ;;  %v1464_v46 = vld [vmem:[%s2576_s1 + $0x1f4] sm:$0xf0]  ;;  %v1221_v48 = vld [vmem:[%s2576_s1 + $0xd8] sm:$0xf0]  ;;  %v1236_v52 = vor.u32 %v1432_v42, %v1235_v41 }
  0x1b   :  { %v1458_v50 = vld [vmem:[%s2576_s1 + $0x1cc] sm:$0xf]  ;;  %v1349_v51 = vld [vmem:[%s2576_s1 + $0x1d8] sm:$0xf0]  ;;  %v1364_v53 = vor.u32 %v1464_v46, %v1363_v43  ;;  %v1224_v54 = vor.u32 %v1426_v47, %v1221_v48  ;;  %v1219_v55 = vld [vmem:[%s2576_s1 + $0xc8] sm:$0xf] }
  0x1c   :  { %431 = vmatpush.bf16.msra.mxu0 %v1132_v16  ;;  %v1428_v56 = vld [vmem:[%s2576_s1 + $0xd4] sm:$0xf0]  ;;  %v1347_v57 = vld [vmem:[%s2576_s1 + $0x1c8] sm:$0xf]  ;;  %v1352_v58 = vor.u32 %v1458_v50, %v1349_v51  ;;  %v1422_v60 = vld [vmem:[%s2576_s1 + $0xac] sm:$0xf] }
  0x1d   :  { %450 = vmatpush.bf16.msra.mxu1 %v1260_v19  ;;  %469 = vmatpush.bf16.msra.mxu2 %v1136_v20  ;;  %v1460_v59 = vld [vmem:[%s2576_s1 + $0x1d4] sm:$0xf0]  ;;  %v1205_v61 = vld [vmem:[%s2576_s1 + $0xb8] sm:$0xf0]  ;;  %v1454_v62 = vld [vmem:[%s2576_s1 + $0x1ac] sm:$0xf]  ;;  %v1220_v0 = vor.u32 %v1428_v56, %v1219_v55 }
  0x1e   :  { %488 = vmatpush.bf16.msra.mxu3 %v1264_v24  ;;  %v1333_v63 = vld [vmem:[%s2576_s1 + $0x1b8] sm:$0xf0]  ;;  %v1348_v1 = vor.u32 %v1460_v59, %v1347_v57  ;;  %v1208_v2 = vor.u32 %v1422_v60, %v1205_v61  ;;  %v1203_v3 = vld [vmem:[%s2576_s1 + $0xa8] sm:$0xf]  ;;  %v1424_v4 = vld [vmem:[%s2576_s1 + $0xb4] sm:$0xf0] }
  0x1f   :  { %v1331_v5 = vld [vmem:[%s2576_s1 + $0x1a8] sm:$0xf]  ;;  %v1336_v6 = vor.u32 %v1454_v62, %v1333_v63  ;;  %v1456_v7 = vld [vmem:[%s2576_s1 + $0x1b4] sm:$0xf0]  ;;  %v1418_v8 = vld [vmem:[%s2576_s1 + $0x8c] sm:$0xf]  ;;  %v1204_v12 = vor.u32 %v1424_v4, %v1203_v3 }
  0x20   :  { %432 = vmatpush.bf16.msra.mxu0 %v1116_v31  ;;  %v1189_v9 = vld [vmem:[%s2576_s1 + $0x98] sm:$0xf0]  ;;  %v1450_v10 = vld [vmem:[%s2576_s1 + $0x18c] sm:$0xf]  ;;  %v1187_v13 = vld [vmem:[%s2576_s1 + $0x88] sm:$0xf]  ;;  %v1332_v14 = vor.u32 %v1456_v7, %v1331_v5 }
  0x21   :  { %451 = vmatpush.bf16.msra.mxu1 %v1244_v35  ;;  %470 = vmatpush.bf16.msra.mxu2 %v1120_v36  ;;  %v1317_v11 = vld [vmem:[%s2576_s1 + $0x198] sm:$0xf0]  ;;  %v1192_v15 = vor.u32 %v1418_v8, %v1189_v9  ;;  %v1420_v16 = vld [vmem:[%s2576_s1 + $0x94] sm:$0xf0]  ;;  %v1315_v17 = vld [vmem:[%s2576_s1 + $0x188] sm:$0xf] }
  0x22   :  { %489 = vmatpush.bf16.msra.mxu3 %v1248_v39  ;;  %v1452_v18 = vld [vmem:[%s2576_s1 + $0x194] sm:$0xf0]  ;;  %v1320_v19 = vor.u32 %v1450_v10, %v1317_v11  ;;  %v1107_v20 = vld [vmem:[%s2577_s0 + $0x10] sm:$0xf]  ;;  %v1414_v21 = vld [vmem:[%s2576_s1 + $0x6c] sm:$0xf]  ;;  %v1188_v26 = vor.u32 %v1420_v16, %v1187_v13 }
  0x23   :  { %433 = vmatmul.bf16.vlgmr.msra.gmra.mxu0 %v1724_v44  ;;  %v1173_v22 = vld [vmem:[%s2576_s1 + $0x78] sm:$0xf0]  ;;  %v1400_v23 = vld [vmem:[%s2577_s0 + $0x14] sm:$0xf0]  ;;  %v1446_v24 = vld [vmem:[%s2576_s1 + $0x16c] sm:$0xf]  ;;  %v1316_v29 = vor.u32 %v1452_v18, %v1315_v17 }
  0x24   :  { %452 = vmatmul.bf16.vlgmr.msra.gmra.mxu1 %v1735_v49  ;;  %471 = vmatmul.bf16.vlgmr.msra.gmra.mxu2 %v1724_v44  ;;  %v1301_v25 = vld [vmem:[%s2576_s1 + $0x178] sm:$0xf0]  ;;  %v1399_v27 = vld [vmem:[%s2577_s0 + $0x14] sm:$0xf]  ;;  %v1176_v30 = vor.u32 %v1414_v21, %v1173_v22  ;;  %v1171_v31 = vld [vmem:[%s2576_s1 + $0x68] sm:$0xf]  ;;  %v1840_v34 = vor.u32 %v1400_v23, %v1107_v20 }
  0x25   :  { %539 = vmatpush.bf16.msrb.mxu2 %v1240_v40  ;;  %490 = vmatmul.bf16.vlgmr.msra.gmra.mxu3 %v1735_v49  ;;  %v1109_v28 = vld [vmem:[%s2577_s0 + $0x18] sm:$0xf0]  ;;  %v1416_v32 = vld [vmem:[%s2576_s1 + $0x74] sm:$0xf0]  ;;  %v1299_v33 = vld [vmem:[%s2576_s1 + $0x168] sm:$0xf]  ;;  %v1304_v35 = vor.u32 %v1446_v24, %v1301_v25 }
  0x26   :  { %558 = vmatpush.bf16.msrb.mxu3 %v1368_v45  ;;  %501 = vmatpush.bf16.msrb.mxu0 %v1236_v52  ;;  %v1448_v36 = vld [vmem:[%s2576_s1 + $0x174] sm:$0xf0]  ;;  %v1410_v37 = vld [vmem:[%s2576_s1 + $0x4c] sm:$0xf]  ;;  %v1157_v38 = vld [vmem:[%s2576_s1 + $0x58] sm:$0xf0]  ;;  %v1851_v39 = vor.u32 %v1399_v27, %v1109_v28  ;;  %v1172_v42 = vor.u32 %v1416_v32, %v1171_v31 }
  0x27   :  { %520 = vmatpush.bf16.msrb.mxu1 %v1364_v53  ;;  %v1442_v40 = vld [vmem:[%s2576_s1 + $0x14c] sm:$0xf]  ;;  %v1285_v41 = vld [vmem:[%s2576_s1 + $0x158] sm:$0xf0]  ;;  %v1300_v43 = vor.u32 %v1448_v36, %v1299_v33  ;;  %v1160_v45 = vor.u32 %v1410_v37, %v1157_v38  ;;  %v1155_v46 = vld [vmem:[%s2576_s1 + $0x48] sm:$0xf] }
  0x28   :  { %v1412_v47 = vld [vmem:[%s2576_s1 + $0x54] sm:$0xf0]  ;;  %v1283_v48 = vld [vmem:[%s2576_s1 + $0x148] sm:$0xf]  ;;  %v1288_v50 = vor.u32 %v1442_v40, %v1285_v41  ;;  %v1406_v52 = vld [vmem:[%s2576_s1 + $0x2c] sm:$0xf] }
  0x29   :  { %540 = vmatpush.bf16.msrb.mxu2 %v1224_v54  ;;  %v1444_v51 = vld [vmem:[%s2576_s1 + $0x154] sm:$0xf0]  ;;  %v1141_v53 = vld [vmem:[%s2576_s1 + $0x38] sm:$0xf0]  ;;  %v1438_v54 = vld [vmem:[%s2576_s1 + $0x12c] sm:$0xf]  ;;  %v1156_v56 = vor.u32 %v1412_v47, %v1155_v46 }
  0x2a   :  { %559 = vmatpush.bf16.msrb.mxu3 %v1352_v58  ;;  %502 = vmatpush.bf16.msrb.mxu0 %v1220_v0  ;;  %v1269_v55 = vld [vmem:[%s2576_s1 + $0x138] sm:$0xf0]  ;;  %v1284_v57 = vor.u32 %v1444_v51, %v1283_v48  ;;  %v1144_v58 = vor.u32 %v1406_v52, %v1141_v53  ;;  %v1139_v59 = vld [vmem:[%s2576_s1 + $0x28] sm:$0xf]  ;;  %v1408_v60 = vld [vmem:[%s2576_s1 + $0x34] sm:$0xf0] }
  0x2b   :  { %521 = vmatpush.bf16.msrb.mxu1 %v1348_v1  ;;  %v1267_v61 = vld [vmem:[%s2576_s1 + $0x128] sm:$0xf]  ;;  %v1272_v62 = vor.u32 %v1438_v54, %v1269_v55  ;;  %v1440_v63 = vld [vmem:[%s2576_s1 + $0x134] sm:$0xf0]  ;;  %v1402_v0 = vld [vmem:[%s2576_s1 + $0xc] sm:$0xf]  ;;  %v1140_v4 = vor.u32 %v1408_v60, %v1139_v59 }
  0x2c   :  { %v1125_v1 = vld [vmem:[%s2576_s1 + $0x18] sm:$0xf0]  ;;  %v1268_v5 = vor.u32 %v1440_v63, %v1267_v61  ;;  %v1123_v7 = vld [vmem:[%s2576_s1 + $0x8] sm:$0xf]  ;;  %v1404_v8 = vld [vmem:[%s2576_s1 + $0x14] sm:$0xf0] }
  0x2d   :  { %541 = vmatpush.bf16.msrb.mxu2 %v1208_v2  ;;  %v1434_v2 = vld [vmem:[%s2576_s1 + $0x10c] sm:$0xf]  ;;  %v1253_v3 = vld [vmem:[%s2576_s1 + $0x118] sm:$0xf0]  ;;  %v1251_v10 = vld [vmem:[%s2576_s1 + $0x108] sm:$0xf] }
  0x2e   :  { %560 = vmatpush.bf16.msrb.mxu3 %v1336_v6  ;;  %503 = vmatpush.bf16.msrb.mxu0 %v1204_v12  ;;  %v1128_v6 = vor.u32 %v1402_v0, %v1125_v1  ;;  %v1256_v9 = vor.u32 %v1434_v2, %v1253_v3  ;;  %v1436_v11 = vld [vmem:[%s2576_s1 + $0x114] sm:$0xf0]  ;;  %v1124_v12 = vor.u32 %v1404_v8, %v1123_v7  ;;  %v1937_v16 = vld [vmem:[%s2578_s2 + $0x70] sm:$0xff]  ;;  %v1952_v18 = vld [vmem:[%s2578_s2 + $0x68] sm:$0xff] }
  0x2f   :  { %522 = vmatpush.bf16.msrb.mxu1 %v1332_v14  ;;  %v1252_v13 = vor.u32 %v1436_v11, %v1251_v10  ;;  %v1926_v14 = vld [vmem:[%s2578_s2 + $0x78] sm:$0xff]  ;;  %v1943_v17 = vld [vmem:[%s2578_s2 + $0xf0] sm:$0xff]  ;;  %v1989_v22 = vld [vmem:[%s2578_s2 + $0x48] sm:$0xff] }
  0x30   :  { %v1976_v20 = vld [vmem:[%s2578_s2 + $0x58] sm:$0xff]  ;;  %v1983_v21 = vld [vmem:[%s2578_s2 + $0x50] sm:$0xff]  ;;  %v2000_v23 = vld [vmem:[%s2578_s2 + $0x40] sm:$0xff] }
  0x31   :  { %542 = vmatpush.bf16.msrb.mxu2 %v1192_v15  ;;  %v1931_v15 = vld [vmem:[%s2578_s2 + $0xf8] sm:$0xff]  ;;  %v2022_v27 = vld [vmem:[%s2578_s2 + $0x30] sm:$0xff]  ;;  %v2029_v28 = vld [vmem:[%s2578_s2 + $0xc8] sm:$0xff] }
  0x32   :  { %561 = vmatpush.bf16.msrb.mxu3 %v1320_v19  ;;  %504 = vmatpush.bf16.msrb.mxu0 %v1188_v26  ;;  %v1957_v19 = vld [vmem:[%s2578_s2 + $0xe8] sm:$0xff]  ;;  %v2005_v24 = vld [vmem:[%s2578_s2 + $0xd8] sm:$0xff]  ;;  %v2017_v26 = vld [vmem:[%s2578_s2 + $0xd0] sm:$0xff] }
  0x33   :  { %523 = vmatpush.bf16.msrb.mxu1 %v1316_v29  ;;  %438 = vmatmul.bf16.gmra.mxu0 %v1840_v34  ;;  %v2012_v25 = vld [vmem:[%s2578_s2 + $0x38] sm:$0xff]  ;;  %v2036_v29 = vld [vmem:[%s2578_s2 + $0x28] sm:$0xff]  ;;  %v2048_v31 = vld [vmem:[%s2578_s2 + $0x20] sm:$0xff] }
  0x34   :  { %457 = vmatmul.bf16.gmra.mxu1 %v1851_v39  ;;  %476 = vmatmul.bf16.gmra.mxu2 %v1840_v34  ;;  %v2053_v32 = vld [vmem:[%s2578_s2 + $0xb8] sm:$0xff]  ;;  %v2077_v36 = vld [vmem:[%s2578_s2 + $0xa8] sm:$0xff]  ;;  %v2089_v38 = vld [vmem:[%s2578_s2 + $0xa0] sm:$0xff] }
  0x35   :  { %543 = vmatpush.bf16.msrb.mxu2 %v1176_v30  ;;  %495 = vmatmul.bf16.gmra.mxu3 %v1851_v39  ;;  %v2041_v30 = vld [vmem:[%s2578_s2 + $0xc0] sm:$0xff]  ;;  %v2060_v33 = vld [vmem:[%s2578_s2 + $0x18] sm:$0xff]  ;;  %v2084_v37 = vld [vmem:[%s2578_s2 + $0x8] sm:$0xff] }
  0x36   :  { %562 = vmatpush.bf16.msrb.mxu3 %v1304_v35  ;;  %505 = vmatpush.bf16.msrb.mxu0 %v1172_v42  ;;  %v2072_v35 = vld [vmem:[%s2578_s2 + $0x10] sm:$0xff]  ;;  %v2101_v40 = vld [vmem:[%s2578_s2 + $0x98] sm:$0xff]  ;;  %v2135_v46 = vld [vmem:[%s2578_s2 + $0x80] sm:$0xff] }
  0x37   :  { %524 = vmatpush.bf16.msrb.mxu1 %v1300_v43  ;;  %v2109_v41 = vld [vmem:[%s2578_s2 + $0x178] sm:$0xff]  ;;  %v2114_v42 = vld [vmem:[%s2578_s2 + $0x90] sm:$0xff]  ;;  %v2122_v43 = vld [vmem:[%s2578_s2 + $0x88] sm:$0xff] }
  0x38   :  { %v2140_v47 = vld [vmem:[%s2578_s2 + $0x168] sm:$0xff]  ;;  %v2149_v48 = vld [vmem:[%s2578_s2 + $0x160] sm:$0xff]  ;;  %v2163_v51 = vld [vmem:[%s2578_s2 + $0x158] sm:$0xff] }
  0x39   :  { %544 = vmatpush.bf16.msrb.mxu2 %v1160_v45  ;;  %v2127_v45 = vld [vmem:[%s2578_s2 + $0x170] sm:$0xff]  ;;  %v2182_v54 = vld [vmem:[%s2578_s2 + $0x1e8] sm:$0xff]  ;;  %v2207_v60 = vld [vmem:[%s2578_s2 + $0x140] sm:$0xff] }
  0x3a   :  { %563 = vmatpush.bf16.msrb.mxu3 %v1288_v50  ;;  %506 = vmatpush.bf16.msrb.mxu0 %v1156_v56  ;;  %v2154_v50 = vld [vmem:[%s2578_s2 + $0x1f8] sm:$0xff]  ;;  %v2168_v52 = vld [vmem:[%s2578_s2 + $0x1f0] sm:$0xff]  ;;  %v2191_v56 = vld [vmem:[%s2578_s2 + $0x148] sm:$0xff] }
  0x3b   :  { %525 = vmatpush.bf16.msrb.mxu1 %v1284_v57  ;;  %v2177_v53 = vld [vmem:[%s2578_s2 + $0x150] sm:$0xff]  ;;  %v2196_v57 = vld [vmem:[%s2578_s2 + $0x1e0] sm:$0xff]  ;;  %v2212_v61 = vld [vmem:[%s2578_s2 + $0x1d8] sm:$0xff] }
  0x3c   :  { %v2223_v63 = vld [vmem:[%s2578_s2 + $0x138] sm:$0xff]  ;;  %v2228_v0 = vld [vmem:[%s2578_s2 + $0x1d0] sm:$0xff]  ;;  %v2246_v2 = vld [vmem:[%s2578_s2 + $0x1c8] sm:$0xff] }
  0x3d   :  { %545 = vmatpush.bf16.msrb.mxu2 %v1144_v58  ;;  %v2241_v1 = vld [vmem:[%s2578_s2 + $0x130] sm:$0xff]  ;;  %v2260_v7 = vld [vmem:[%s2578_s2 + $0x1c0] sm:$0xff] }
  0x3e   :  { %564 = vmatpush.bf16.msrb.mxu3 %v1272_v62  ;;  %507 = vmatpush.bf16.msrb.mxu0 %v1140_v4  ;;  %v2271_v11 = vld [vmem:[%s2578_s2 + $0x120] sm:$0xff] }
  0x3f   :  { %526 = vmatpush.bf16.msrb.mxu1 %v1268_v5 }
  0x41   :  { %546 = vmatpush.bf16.msrb.mxu2 %v1128_v6  ;;  %v2255_v6 = vld [vmem:[%s2578_s2 + $0x128] sm:$0xff] }
  0x42   :  { %565 = vmatpush.bf16.msrb.mxu3 %v1256_v9  ;;  %508 = vmatpush.bf16.msrb.mxu0 %v1124_v12  ;;  %v2276_v12 = vld [vmem:[%s2578_s2 + $0x1b8] sm:$0xff] }
  0x43   :  { %527 = vmatpush.bf16.msrb.mxu1 %v1252_v13 }
  0x44   :  { %547 = vmatmul.bf16.vlgmr.msrb.gmra.mxu2 %v1724_v44 }
  0x45   :  { %509 = vmatmul.bf16.vlgmr.msrb.gmra.mxu0 %v1724_v44  ;;  %566 = vmatmul.bf16.vlgmr.msrb.gmra.mxu3 %v1735_v49  ;;  %v1964_v44 = vld [vmem:[%s2578_s2 + $0x60] sm:$0xff] }
  0x46   :  { %856 = vmatpush.msra.mxu0 %v1926_v14  ;;  %528 = vmatmul.bf16.vlgmr.msrb.gmra.mxu1 %v1735_v49  ;;  %v1969_v49 = vld [vmem:[%s2578_s2 + $0xe0] sm:$0xff] }
  0x47   :  { %876 = vmatpush.msra.mxu1 %v1931_v15  ;;  %896 = vmatpush.msra.mxu2 %v2109_v41 }
  0x48   :  { %857 = vmatpush.msra.mxu0 %v1937_v16  ;;  %916 = vmatpush.msra.mxu3 %v2154_v50 }
  0x49   :  { %877 = vmatpush.msra.mxu1 %v1943_v17  ;;  %897 = vmatpush.msra.mxu2 %v2127_v45 }
  0x4a   :  { %858 = vmatpush.msra.mxu0 %v1952_v18  ;;  %917 = vmatpush.msra.mxu3 %v2168_v52 }
  0x4b   :  { %878 = vmatpush.msra.mxu1 %v1957_v19  ;;  %898 = vmatpush.msra.mxu2 %v2140_v47 }
  0x4c   :  { %859 = vmatpush.msra.mxu0 %v1964_v44  ;;  %918 = vmatpush.msra.mxu3 %v2182_v54 }
  0x4d   :  { %879 = vmatpush.msra.mxu1 %v1969_v49  ;;  %899 = vmatpush.msra.mxu2 %v2149_v48 }
  0x4e   :  { %860 = vmatpush.msra.mxu0 %v1976_v20  ;;  %919 = vmatpush.msra.mxu3 %v2196_v57 }
  0x4f   :  { %880 = vmatpush.msra.mxu1 %v2005_v24  ;;  %900 = vmatpush.msra.mxu2 %v2163_v51 }
  0x50   :  { %861 = vmatpush.msra.mxu0 %v1983_v21  ;;  %920 = vmatpush.msra.mxu3 %v2212_v61 }
  0x51   :  { %881 = vmatpush.msra.mxu1 %v2017_v26  ;;  %901 = vmatpush.msra.mxu2 %v2177_v53 }
  0x52   :  { %862 = vmatpush.msra.mxu0 %v1989_v22  ;;  %921 = vmatpush.msra.mxu3 %v2228_v0 }
  0x53   :  { %882 = vmatpush.msra.mxu1 %v2029_v28  ;;  %902 = vmatpush.msra.mxu2 %v2191_v56 }
  0x54   :  { %552 = vmatmul.bf16.gmra.mxu2 %v1840_v34  ;;  %863 = vmatpush.msra.mxu0 %v2000_v23 }
  0x55   :  { %514 = vmatmul.bf16.gmra.mxu0 %v1840_v34  ;;  %571 = vmatmul.bf16.gmra.mxu3 %v1851_v39  ;;  %v2065_v34 = vld [vmem:[%s2578_s2 + $0xb0] sm:$0xff] }
  0x56   :  { %533 = vmatmul.bf16.gmra.mxu1 %v1851_v39  ;;  %864 = vmatpush.msra.mxu0 %v2012_v25  ;;  %v2096_v39 = vld [vmem:[%s2578_s2] sm:$0xff] }
  0x57   :  { %883 = vmatpush.msra.mxu1 %v2041_v30  ;;  %903 = vmatpush.msra.mxu2 %v2207_v60 }
  0x58   :  { %865 = vmatpush.msra.mxu0 %v2022_v27  ;;  %922 = vmatpush.msra.mxu3 %v2246_v2 }
  0x59   :  { %884 = vmatpush.msra.mxu1 %v2053_v32  ;;  %904 = vmatpush.msra.mxu2 %v2223_v63 }
  0x5a   :  { %866 = vmatpush.msra.mxu0 %v2036_v29  ;;  %923 = vmatpush.msra.mxu3 %v2260_v7 }
  0x5b   :  { %885 = vmatpush.msra.mxu1 %v2065_v34  ;;  %905 = vmatpush.msra.mxu2 %v2241_v1 }
  0x5c   :  { %867 = vmatpush.msra.mxu0 %v2048_v31  ;;  %924 = vmatpush.msra.mxu3 %v2276_v12 }
  0x5d   :  { %886 = vmatpush.msra.mxu1 %v2077_v36  ;;  %906 = vmatpush.msra.mxu2 %v2255_v6 }
  0x5e   :  { %868 = vmatpush.msra.mxu0 %v2060_v33 }
  0x5f   :  { %887 = vmatpush.msra.mxu1 %v2089_v38  ;;  %907 = vmatpush.msra.mxu2 %v2271_v11 }
  0x60   :  { %869 = vmatpush.msra.mxu0 %v2072_v35 }
  0x61   :  { %888 = vmatpush.msra.mxu1 %v2101_v40 }
  0x62   :  { %870 = vmatpush.msra.mxu0 %v2084_v37 }
  0x63   :  { %889 = vmatpush.msra.mxu1 %v2114_v42 }
  0x64   :  { %871 = vmatpush.msra.mxu0 %v2096_v39 }
  0x65   :  { %890 = vmatpush.msra.mxu1 %v2122_v43 }
  0x66   :  { %1003 = vmatpush.msrb.mxu0 %v1926_v14 }
  0x67   :  { %891 = vmatpush.msra.mxu1 %v2135_v46 }
  0x68   :  { %1004 = vmatpush.msrb.mxu0 %v1937_v16  ;;  %v2292_v16 = vld [vmem:[%s2578_s2 + $0x1b0] sm:$0xff] }
  0x69   :  { %1023 = vmatpush.msrb.mxu1 %v1931_v15  ;;  %v2287_v15 = vld [vmem:[%s2578_s2 + $0x118] sm:$0xff]  ;;  %925 = vmatpush.msra.mxu3 %v2292_v16 }
  0x6a   :  { %1005 = vmatpush.msrb.mxu0 %v1952_v18  ;;  %908 = vmatpush.msra.mxu2 %v2287_v15  ;;  %v2311_v18 = vld [vmem:[%s2578_s2 + $0x110] sm:$0xff] }
  0x6b   :  { %1024 = vmatpush.msrb.mxu1 %v1943_v17 }
  0x6c   :  { %1006 = vmatpush.msrb.mxu0 %v1964_v44  ;;  %909 = vmatpush.msra.mxu2 %v2311_v18 }
  0x6d   :  { %1025 = vmatpush.msrb.mxu1 %v1957_v19  ;;  %v2316_v19 = vld [vmem:[%s2578_s2 + $0x1a8] sm:$0xff] }
  0x6e   :  { %1007 = vmatpush.msrb.mxu0 %v1976_v20  ;;  %926 = vmatpush.msra.mxu3 %v2316_v19 }
  0x6f   :  { %1026 = vmatpush.msrb.mxu1 %v1969_v49 }
  0x70   :  { %1008 = vmatpush.msrb.mxu0 %v1983_v21 }
  0x71   :  { %1027 = vmatpush.msrb.mxu1 %v2005_v24 }
  0x72   :  { %1009 = vmatpush.msrb.mxu0 %v1989_v22  ;;  %v2327_v22 = vld [vmem:[%s2578_s2 + $0x108] sm:$0xff] }
  0x73   :  { %1028 = vmatpush.msrb.mxu1 %v2017_v26  ;;  %910 = vmatpush.msra.mxu2 %v2327_v22  ;;  %v2343_v26 = vld [vmem:[%s2578_s2 + $0x100] sm:$0xff] }
  0x74   :  { %1010 = vmatpush.msrb.mxu0 %v2000_v23  ;;  %v2332_v23 = vld [vmem:[%s2578_s2 + $0x1a0] sm:$0xff] }
  0x75   :  { %1029 = vmatpush.msrb.mxu1 %v2029_v28  ;;  %927 = vmatpush.msra.mxu3 %v2332_v23 }
  0x76   :  { %1011 = vmatpush.msrb.mxu0 %v2012_v25  ;;  %911 = vmatpush.msra.mxu2 %v2343_v26 }
  0x77   :  { %1030 = vmatpush.msrb.mxu1 %v2041_v30 }
  0x78   :  { %1012 = vmatpush.msrb.mxu0 %v2022_v27  ;;  %v2348_v27 = vld [vmem:[%s2578_s2 + $0x198] sm:$0xff]  ;;  %1043 = vmatpush.msrb.mxu2 %v2109_v41 }
  0x79   :  { %1031 = vmatpush.msrb.mxu1 %v2053_v32  ;;  %928 = vmatpush.msra.mxu3 %v2348_v27  ;;  %v2374_v32 = vld [vmem:[%s2578_s2 + $0x188] sm:$0xff] }
  0x7a   :  { %1013 = vmatpush.msrb.mxu0 %v2036_v29  ;;  %v2361_v29 = vld [vmem:[%s2578_s2 + $0x190] sm:$0xff]  ;;  %1044 = vmatpush.msrb.mxu2 %v2127_v45 }
  0x7b   :  { %1032 = vmatpush.msrb.mxu1 %v2065_v34  ;;  %929 = vmatpush.msra.mxu3 %v2361_v29 }
  0x7c   :  { %1014 = vmatpush.msrb.mxu0 %v2048_v31  ;;  %1045 = vmatpush.msrb.mxu2 %v2140_v47 }
  0x7d   :  { %1033 = vmatpush.msrb.mxu1 %v2077_v36  ;;  %930 = vmatpush.msra.mxu3 %v2374_v32 }
  0x7e   :  { %1015 = vmatpush.msrb.mxu0 %v2060_v33  ;;  %1046 = vmatpush.msrb.mxu2 %v2149_v48 }
  0x7f   :  { %1034 = vmatpush.msrb.mxu1 %v2089_v38 }
  0x80   :  { %1016 = vmatpush.msrb.mxu0 %v2072_v35  ;;  %1047 = vmatpush.msrb.mxu2 %v2163_v51 }
  0x81   :  { %1035 = vmatpush.msrb.mxu1 %v2101_v40  ;;  %v2385_v40 = vld [vmem:[%s2578_s2 + $0x180] sm:$0xff] }
  0x82   :  { %1017 = vmatpush.msrb.mxu0 %v2084_v37  ;;  %931 = vmatpush.msra.mxu3 %v2385_v40 }
  0x83   :  { %1036 = vmatpush.msrb.mxu1 %v2114_v42  ;;  %1048 = vmatpush.msrb.mxu2 %v2177_v53 }
  0x84   :  { %1018 = vmatpush.msrb.mxu0 %v2096_v39  ;;  %1063 = vmatpush.msrb.mxu3 %v2154_v50 }
  0x85   :  { %1037 = vmatpush.msrb.mxu1 %v2122_v43  ;;  %1049 = vmatpush.msrb.mxu2 %v2191_v56 }
  0x86   :  { %1064 = vmatpush.msrb.mxu3 %v2168_v52 }
  0x87   :  { %1038 = vmatpush.msrb.mxu1 %v2135_v46  ;;  %1050 = vmatpush.msrb.mxu2 %v2207_v60 }
  0x88   :  { %1065 = vmatpush.msrb.mxu3 %v2182_v54 }
  0x89   :  { %1051 = vmatpush.msrb.mxu2 %v2223_v63 }
  0x8a   :  { %1066 = vmatpush.msrb.mxu3 %v2196_v57 }
  0x8b   :  { %1052 = vmatpush.msrb.mxu2 %v2241_v1 }
  0x8c   :  { %1067 = vmatpush.msrb.mxu3 %v2212_v61 }
  0x8d   :  { %1053 = vmatpush.msrb.mxu2 %v2255_v6 }
  0x8e   :  { %1068 = vmatpush.msrb.mxu3 %v2228_v0 }
  0x8f   :  { %1054 = vmatpush.msrb.mxu2 %v2271_v11 }
  0x90   :  { %1069 = vmatpush.msrb.mxu3 %v2246_v2 }
  0x91   :  { %1055 = vmatpush.msrb.mxu2 %v2287_v15 }
  0x92   :  { %1070 = vmatpush.msrb.mxu3 %v2260_v7 }
  0x93   :  { %1056 = vmatpush.msrb.mxu2 %v2311_v18 }
  0x94   :  { %1071 = vmatpush.msrb.mxu3 %v2276_v12 }
  0x95   :  { %1057 = vmatpush.msrb.mxu2 %v2327_v22 }
  0x96   :  { %1072 = vmatpush.msrb.mxu3 %v2292_v16 }
  0x97   :  { %1058 = vmatpush.msrb.mxu2 %v2343_v26 }
  0x98   :  { %1073 = vmatpush.msrb.mxu3 %v2316_v19 }
  0x9a   :  { %1074 = vmatpush.msrb.mxu3 %v2332_v23 }
  0x9c   :  { %1075 = vmatpush.msrb.mxu3 %v2348_v27 }
  0x9e   :  { %1076 = vmatpush.msrb.mxu3 %v2361_v29 }
  0xa0   :  { %v434_v55 = vpop.f32.mrf.mxu0  ;;  %1077 = vmatpush.msrb.mxu3 %v2374_v32 }
  0xa1   :  { %v453_v58 = vpop.f32.mrf.mxu1 }
  0xa2   :  { %v2200_v59 = vadd.f32 %v453_v58, %v434_v55  ;;  %1078 = vmatpush.msrb.mxu3 %v2385_v40 }
  0xa4   :  { %v577_v62 = vpack.c.bf16 %v2200_v59, %v2200_v59  ;;  %v733_v33 = vmul.f32 %v2200_v59, %v2200_v59 }
  0xa6   :  { %590 = vrot.lane.b32.xlu0 %v577_v62, %s1467_s24  ;;  %582 = vst.msk [vmem:[%s2579_s3] sm:$0xf] %vm581_vm0, %v577_v62 }
  0xa7   :  { %v472_v3 = vpop.f32.mrf.mxu2 }
  0xa8   :  { %v491_v4 = vpop.f32.mrf.mxu3  ;;  %v436_v5 = vpop.f32.mrf.mxu0 }
  0xa9   :  { %v2262_v8 = vadd.f32 %v491_v4, %v472_v3  ;;  %v455_v9 = vpop.f32.mrf.mxu1 }
  0xaa   :  { %v456_v10 = vadd.f32 %v455_v9, %v436_v5 }
  0xab   :  { %v607_v13 = vpack.c.bf16 %v2262_v8, %v2262_v8  ;;  %v734_v4 = vmul.f32 %v2262_v8, %v2262_v8 }
  0xac   :  { %v578_v14 = vpack.c.bf16 %v456_v10, %v456_v10  ;;  %v737_v30 = vmul.f32 %v456_v10, %v456_v10  ;;  %v697_v34 = vadd.f32 %v456_v10, %v2200_v59 }
  0xad   :  { %620 = vrot.lane.b32.xlu2 %v607_v13, %s1467_s24  ;;  %1373 = vst.msk [vmem:[%s2579_s3 + $0x10] sm:$0xf] %vm581_vm0, %v607_v13 }
  0xae   :  { %583 = vst.msk [vmem:[%s2579_s3 + $0x4] sm:$0xf] %vm581_vm0, %v578_v14  ;;  %592 = vrot.lane.b32.xlu0 %v578_v14, %s1467_s24  ;;  %v749_v41 = vadd.f32 %v737_v30, %v733_v33 }
  0xaf   :  { %v474_v17 = vpop.f32.mrf.mxu2 }
  0xb0   :  { %v493_v44 = vpop.f32.mrf.mxu3  ;;  %v439_v49 = vpop.f32.mrf.mxu0 }
  0xb1   :  { %v2320_v20 = vadd.f32 %v493_v44, %v474_v17  ;;  %v458_v21 = vpop.f32.mrf.mxu1 }
  0xb2   :  { %v459_v24 = vadd.f32 %v458_v21, %v439_v49 }
  0xb3   :  { %v608_v25 = vpack.c.bf16 %v2320_v20, %v2320_v20  ;;  %v738_v58 = vmul.f32 %v2320_v20, %v2320_v20  ;;  %v706_v50 = vadd.f32 %v2320_v20, %v2262_v8 }
  0xb4   :  { %v579_v28 = vpack.c.bf16 %v459_v24, %v459_v24  ;;  %v741_v35 = vmul.f32 %v459_v24, %v459_v24  ;;  %v698_v42 = vadd.f32 %v697_v34, %v459_v24 }
  0xb5   :  { %1374 = vst.msk [vmem:[%s2579_s3 + $0x14] sm:$0xf] %vm581_vm0, %v608_v25  ;;  %622 = vrot.lane.b32.xlu2 %v608_v25, %s1467_s24  ;;  %v758_v10 = vadd.f32 %v738_v58, %v734_v4 }
  0xb6   :  { %594 = vrot.lane.b32.xlu1 %v579_v28, %s1467_s24  ;;  %584 = vst.msk [vmem:[%s2579_s3 + $0x40] sm:$0xf] %vm581_vm0, %v579_v28  ;;  %v750_v45 = vadd.f32 %v749_v41, %v741_v35 }
  0xb7   :  { %v477_v31 = vpop.f32.mrf.mxu2 }
  0xb8   :  { %v496_v36 = vpop.f32.mrf.mxu3  ;;  %v441_v37 = vpop.f32.mrf.mxu0 }
  0xb9   :  { %v497_v38 = vadd.f32 %v496_v36, %v477_v31  ;;  %v460_v39 = vpop.f32.mrf.mxu1 }
  0xba   :  { %v461_v55 = vadd.f32 %v460_v39, %v441_v37 }
  0xbb   :  { %v609_v43 = vpack.c.bf16 %v497_v38, %v497_v38  ;;  %v742_v46 = vmul.f32 %v497_v38, %v497_v38  ;;  %v707_v17 = vadd.f32 %v706_v50, %v497_v38 }
  0xbc   :  { %v699_v59 = vadd.f32 %v698_v42, %v461_v55  ;;  %v745_v62 = vmul.f32 %v461_v55, %v461_v55  ;;  %v580_v3 = vpack.c.bf16 %v461_v55, %v461_v55 }
  0xbd   :  { %1375 = vst.msk [vmem:[%s2579_s3 + $0x50] sm:$0xf] %vm581_vm0, %v609_v43  ;;  %624 = vrot.lane.b32.xlu0 %v609_v43, %s1467_s24  ;;  %v759_v21 = vadd.f32 %v758_v10, %v742_v46 }
  0xbe   :  { %v700_v47 = vrot.slane %v699_v59, 4  ;;  %v751_v5 = vadd.f32 %v750_v45, %v745_v62  ;;  %585 = vst.msk [vmem:[%s2579_s3 + $0x44] sm:$0xf] %vm581_vm0, %v580_v3  ;;  %596 = vrot.lane.b32.xlu1 %v580_v3, %s1467_s24 }
  0xbf   :  { %v479_v9 = vpop.f32.mrf.mxu2 }
  0xc0   :  { %v701_v48 = vadd.f32 %v700_v47, %v699_v59  ;;  %v752_v13 = vrot.slane %v751_v5, 4  ;;  %v498_v14 = vpop.f32.mrf.mxu3 }
  0xc1   :  { %v499_v44 = vadd.f32 %v498_v14, %v479_v9 }
  0xc2   :  { %v510_v49 = vpop.f32.mrf.mxu0  ;;  %v702_v24 = vrot.slane %v701_v48, 2  ;;  %v753_v52 = vadd.f32 %v752_v13, %v751_v5 }
  0xc3   :  { %v529_v25 = vpop.f32.mrf.mxu1  ;;  %v708_v8 = vadd.f32 %v707_v17, %v499_v44  ;;  %v746_v20 = vmul.f32 %v499_v44, %v499_v44  ;;  %v610_v28 = vpack.c.bf16 %v499_v44, %v499_v44 }
  0xc4   :  { %v2413_v51 = vadd.f32 %v529_v25, %v510_v49  ;;  %v703_v30 = vadd.f32 %v702_v24, %v701_v48  ;;  %v754_v54 = vrot.slane %v753_v52, 2 }
  0xc5   :  { %v709_v31 = vrot.slane %v708_v8, 4  ;;  %v760_v33 = vadd.f32 %v759_v21, %v746_v20  ;;  %1376 = vst.msk [vmem:[%s2579_s3 + $0x54] sm:$0xf] %vm581_vm0, %v610_v28 }
  0xc6   :  { %v637_v53 = vpack.c.bf16 %v2413_v51, %v2413_v51  ;;  %626 = vrot.lane.b32.xlu1 %v610_v28, %s1467_s24  ;;  %v704_v57 = vrot.slane %v703_v30, 1  ;;  %v755_v60 = vadd.f32 %v754_v54, %v753_v52  ;;  %v735_v23 = vmul.f32 %v2413_v51, %v2413_v51 }
  0xc7   :  { %v710_v56 = vadd.f32 %v709_v31, %v708_v8  ;;  %v761_v34 = vrot.slane %v760_v33, 4  ;;  %v548_v61 = vpop.f32.mrf.mxu2 }
  0xc8   :  { %650 = vrot.lane.b32.xlu2 %v637_v53, %s1467_s24  ;;  %1381 = vst.msk [vmem:[%s2579_s3 + $0x20] sm:$0xf] %vm581_vm0, %v637_v53  ;;  %v567_v35 = vpop.f32.mrf.mxu3  ;;  %v705_v36 = vadd.f32 %v704_v57, %v703_v30  ;;  %v756_v2 = vrot.slane %v755_v60, 1 }
  0xc9   :  { %v711_v37 = vrot.slane %v710_v56, 2  ;;  %v762_v38 = vadd.f32 %v761_v34, %v760_v33  ;;  %v2433_v0 = vadd.f32 %v567_v35, %v548_v61 }
  0xca   :  { %v512_v39 = vpop.f32.mrf.mxu0  ;;  %872 = vmatmul.f32.vlgmr.msra.gmra.mxu0 %v705_v36  ;;  %v757_v12 = vadd.f32 %v756_v2, %v755_v60 }
  0xcb   :  { %v531_v41 = vpop.f32.mrf.mxu1  ;;  %v712_v42 = vadd.f32 %v711_v37, %v710_v56  ;;  %v763_v55 = vrot.slane %v762_v38, 2  ;;  %v667_v63 = vpack.c.bf16 %v2433_v0, %v2433_v0  ;;  %v736_v32 = vmul.f32 %v2433_v0, %v2433_v0 }
  0xcc   :  { %v532_v58 = vadd.f32 %v531_v41, %v512_v39 }
  0xcd   :  { %v713_v43 = vrot.slane %v712_v42, 1  ;;  %1389 = vst.msk [vmem:[%s2579_s3 + $0x30] sm:$0xf] %vm581_vm0, %v667_v63  ;;  %680 = vrot.lane.b32.xlu0 %v667_v63, %s1467_s24  ;;  %v764_v7 = vadd.f32 %v763_v55, %v762_v38 }
  0xce   :  { %v638_v45 = vpack.c.bf16 %v532_v58, %v532_v58  ;;  %v739_v18 = vmul.f32 %v532_v58, %v532_v58  ;;  %v715_v47 = vadd.f32 %v532_v58, %v2413_v51 }
  0xcf   :  { %v550_v1 = vpop.f32.mrf.mxu2  ;;  %v714_v6 = vadd.f32 %v713_v43, %v712_v42  ;;  %v765_v4 = vrot.slane %v764_v7, 1 }
  0xd0   :  { %1382 = vst.msk [vmem:[%s2579_s3 + $0x24] sm:$0xf] %vm581_vm0, %v638_v45  ;;  %v569_v11 = vpop.f32.mrf.mxu3  ;;  %v767_v10 = vadd.f32 %v739_v18, %v735_v23 }
  0xd1   :  { %v570_v59 = vadd.f32 %v569_v11, %v550_v1  ;;  %892 = vmatmul.f32.vlgmr.msra.gmra.mxu1 %v714_v6  ;;  %v766_v22 = vadd.f32 %v765_v4, %v764_v7 }
  0xd2   :  { %v515_v62 = vpop.f32.mrf.mxu0  ;;  %1019 = vmatmul.f32.vlgmr.msrb.gmra.mxu0 %v757_v12 }
  0xd3   :  { %v534_v16 = vpop.f32.mrf.mxu1  ;;  %v668_v46 = vpack.c.bf16 %v570_v59, %v570_v59  ;;  %v740_v29 = vmul.f32 %v570_v59, %v570_v59  ;;  %v724_v52 = vadd.f32 %v570_v59, %v2433_v0 }
  0xd4   :  { %v535_v3 = vadd.f32 %v534_v16, %v515_v62 }
  0xd5   :  { %1390 = vst.msk [vmem:[%s2579_s3 + $0x34] sm:$0xf] %vm581_vm0, %v668_v46  ;;  %652 = vrot.lane.b32.xlu0 %v638_v45, %s1467_s24  ;;  %v776_v20 = vadd.f32 %v740_v29, %v736_v32 }
  0xd6   :  { %v639_v15 = vpack.c.bf16 %v535_v3, %v535_v3  ;;  %v743_v5 = vmul.f32 %v535_v3, %v535_v3  ;;  %v716_v48 = vadd.f32 %v715_v47, %v535_v3 }
  0xd7   :  { %v553_v19 = vpop.f32.mrf.mxu2 }
  0xd8   :  { %1383 = vst.msk [vmem:[%s2579_s3 + $0x60] sm:$0xf] %vm581_vm0, %v639_v15  ;;  %654 = vrot.lane.b32.xlu1 %v639_v15, %s1467_s24  ;;  %v572_v27 = vpop.f32.mrf.mxu3  ;;  %v768_v17 = vadd.f32 %v767_v10, %v743_v5 }
  0xd9   :  { %v573_v26 = vadd.f32 %v572_v27, %v553_v19  ;;  %1039 = vmatmul.f32.vlgmr.msrb.gmra.mxu1 %v766_v22 }
  0xda   :  { %v517_v50 = vpop.f32.mrf.mxu0 }
  0xdb   :  { %v536_v9 = vpop.f32.mrf.mxu1  ;;  %v669_v14 = vpack.c.bf16 %v573_v26, %v573_v26  ;;  %v744_v24 = vmul.f32 %v573_v26, %v573_v26  ;;  %v725_v28 = vadd.f32 %v724_v52, %v573_v26  ;;  %v1468_v26 = vmov 0.0  }
  0xdc   :  { %v537_v13 = vadd.f32 %v536_v9, %v517_v50  ;;  %789 = vst [vmem:[%s2580_s4] sm:$0x1] %v1468_v26 }
  0xdd   :  { %1391 = vst.msk [vmem:[%s2579_s3 + $0x70] sm:$0xf] %vm581_vm0, %v669_v14  ;;  %v777_v33 = vadd.f32 %v776_v20, %v744_v24 }
  0xde   :  { %v717_v44 = vadd.f32 %v716_v48, %v537_v13  ;;  %v747_v49 = vmul.f32 %v537_v13, %v537_v13  ;;  %v640_v21 = vpack.c.bf16 %v537_v13, %v537_v13  ;;  %790 = vst [vmem:[%s2581_s5] sm:$0x1] %v1468_v26 }
  0xdf   :  { %v555_v40 = vpop.f32.mrf.mxu2 }
  0xe0   :  { %v718_v25 = vrot.slane %v717_v44, 4  ;;  %v769_v8 = vadd.f32 %v768_v17, %v747_v49  ;;  %1384 = vst.msk [vmem:[%s2579_s3 + $0x64] sm:$0xf] %vm581_vm0, %v640_v21  ;;  %656 = vrot.lane.b32.xlu2 %v640_v21, %s1467_s24  ;;  %682 = vrot.lane.b32.xlu1 %v668_v46, %s1467_s24  ;;  %v574_v51 = vpop.f32.mrf.mxu3 }
  0xe1   :  { %v575_v31 = vadd.f32 %v574_v51, %v555_v40 }
  0xe2   :  { %v719_v30 = vadd.f32 %v718_v25, %v717_v44  ;;  %v770_v54 = vrot.slane %v769_v8, 4 }
  0xe3   :  { %v726_v56 = vadd.f32 %v725_v28, %v575_v31  ;;  %v748_v34 = vmul.f32 %v575_v31, %v575_v31  ;;  %v670_v61 = vpack.c.bf16 %v575_v31, %v575_v31  ;;  %v791_v17 = vld [vmem:[%s2580_s4] sm:$0x1] }
  0xe4   :  { %v720_v53 = vrot.slane %v719_v30, 2  ;;  %v771_v57 = vadd.f32 %v770_v54, %v769_v8 }
  0xe5   :  { %v727_v60 = vrot.slane %v726_v56, 4  ;;  %v778_v37 = vadd.f32 %v777_v33, %v748_v34  ;;  %1392 = vst.msk [vmem:[%s2579_s3 + $0x74] sm:$0xf] %vm581_vm0, %v670_v61  ;;  %686 = vrot.lane.b32.xlu0 %v670_v61, %s1467_s24  ;;  %v938_v40 = vld [vmem:[%s2581_s5] sm:$0x1] }
  0xe6   :  { %v721_v35 = vadd.f32 %v720_v53, %v719_v30  ;;  %v772_v36 = vrot.slane %v771_v57, 2 }
  0xe7   :  { %v728_v38 = vadd.f32 %v727_v60, %v726_v56  ;;  %v779_v0 = vrot.slane %v778_v37, 4 }
  0xe8   :  { %684 = vrot.lane.b32.xlu2 %v669_v14, %s1467_s24  ;;  %v722_v39 = vrot.slane %v721_v35, 1  ;;  %v773_v58 = vadd.f32 %v772_v36, %v771_v57 }
  0xe9   :  { %v729_v41 = vrot.slane %v728_v38, 2  ;;  %v780_v42 = vadd.f32 %v779_v0, %v778_v37 }
  0xea   :  { %v723_v55 = vadd.f32 %v722_v39, %v721_v35  ;;  %v774_v45 = vrot.slane %v773_v58, 1 }
  0xeb   :  { %v730_v63 = vadd.f32 %v729_v41, %v728_v38  ;;  %v781_v2 = vrot.slane %v780_v42, 2 }
  0xec   :  { %912 = vmatmul.f32.vlgmr.msra.gmra.mxu2 %v723_v55  ;;  %v775_v7 = vadd.f32 %v774_v45, %v773_v58 }
  0xed   :  { %v731_v43 = vrot.slane %v730_v63, 1  ;;  %v782_v6 = vadd.f32 %v781_v2, %v780_v42 }
  0xef   :  { %v732_v1 = vadd.f32 %v731_v43, %v730_v63  ;;  %v783_v11 = vrot.slane %v782_v6, 1 }
  0xf1   :  { %932 = vmatmul.f32.vlgmr.msra.gmra.mxu3 %v732_v1  ;;  %v784_v12 = vadd.f32 %v783_v11, %v782_v6 }
  0xf4   :  { %1059 = vmatmul.f32.vlgmr.msrb.gmra.mxu2 %v775_v7 }
  0xf9   :  { %1079 = vmatmul.f32.vlgmr.msrb.gmra.mxu3 %v784_v12 }
 0x107   :  { %v621_v59 = vpop.permute.xlu2 %620 }
 0x108   :  { %1377 = vst.msk [vmem:[%s2579_s3 + $0x18] sm:$0xf] %vm581_vm0, %v621_v59 }
 0x10f   :  { %v623_v62 = vpop.permute.xlu2 %622 }
 0x110   :  { %1378 = vst.msk [vmem:[%s2579_s3 + $0x1c] sm:$0xf] %vm581_vm0, %v623_v62 }
 0x118   :  { %v591_v16 = vpop.permute.xlu0 %590 }
 0x119   :  { %1369 = vst.msk [vmem:[%s2579_s3 + $0x8] sm:$0xf] %vm581_vm0, %v591_v16 }
 0x120   :  { %v593_v3 = vpop.permute.xlu0 %592 }
 0x121   :  { %1370 = vst.msk [vmem:[%s2579_s3 + $0xc] sm:$0xf] %vm581_vm0, %v593_v3 }
 0x122   :  { %v651_v4 = vpop.permute.xlu2 %650 }
 0x123   :  { %1385 = vst.msk [vmem:[%s2579_s3 + $0x28] sm:$0xf] %vm581_vm0, %v651_v4 }
 0x128   :  { %v595_v46 = vpop.permute.xlu1 %594 }
 0x129   :  { %1371 = vst.msk [vmem:[%s2579_s3 + $0x48] sm:$0xf] %vm581_vm0, %v595_v46 }
 0x12f   :  { %v625_v15 = vpop.permute.xlu0 %624 }
 0x130   :  { %1379 = vst.msk [vmem:[%s2579_s3 + $0x58] sm:$0xf] %vm581_vm0, %v625_v15  ;;  %v597_v18 = vpop.permute.xlu1 %596 }
 0x131   :  { %1372 = vst.msk [vmem:[%s2579_s3 + $0x4c] sm:$0xf] %vm581_vm0, %v597_v18 }
 0x138   :  { %v627_v19 = vpop.permute.xlu1 %626 }
 0x139   :  { %1380 = vst.msk [vmem:[%s2579_s3 + $0x5c] sm:$0xf] %vm581_vm0, %v627_v19 }
 0x13a   :  { %v657_v22 = vpop.permute.xlu2 %656 }
 0x13b   :  { %1388 = vst.msk [vmem:[%s2579_s3 + $0x6c] sm:$0xf] %vm581_vm0, %v657_v22 }
 0x13f   :  { %v681_v23 = vpop.permute.xlu0 %680 }
 0x140   :  { %1393 = vst.msk [vmem:[%s2579_s3 + $0x38] sm:$0xf] %vm581_vm0, %v681_v23 }
 0x142   :  { %v685_v27 = vpop.permute.xlu2 %684 }
 0x143   :  { %1395 = vst.msk [vmem:[%s2579_s3 + $0x78] sm:$0xf] %vm581_vm0, %v685_v27 }
 0x147   :  { %v653_v47 = vpop.permute.xlu0 %652  ;;  %v873_v48 = vpop.f32.mrf.mxu0 }
 0x148   :  { %1386 = vst.msk [vmem:[%s2579_s3 + $0x2c] sm:$0xf] %vm581_vm0, %v653_v47 }
 0x14a   :  { %v655_v5 = vpop.permute.xlu1 %654 }
 0x14b   :  { %1387 = vst.msk [vmem:[%s2579_s3 + $0x68] sm:$0xf] %vm581_vm0, %v655_v5 }
 0x14e   :  { %v893_v10 = vpop.f32.mrf.mxu1 }
 0x14f   :  { %v894_v14 = vadd.f32 %v893_v10, %v873_v48  ;;  %v1020_v24 = vpop.f32.mrf.mxu0 }
 0x152   :  { %v683_v50 = vpop.permute.xlu1 %682 }
 0x153   :  { %1394 = vst.msk [vmem:[%s2579_s3 + $0x3c] sm:$0xf] %vm581_vm0, %v683_v50 }
 0x156   :  { %v1040_v21 = vpop.f32.mrf.mxu1 }
 0x157   :  { %v687_v9 = vpop.permute.xlu0 %686  ;;  %v1041_v25 = vadd.f32 %v1040_v21, %v1020_v24 }
 0x158   :  { %1396 = vst.msk [vmem:[%s2579_s3 + $0x7c] sm:$0xf] %vm581_vm0, %v687_v9 }
 0x16f   :  { %v913_v13 = vpop.f32.mrf.mxu2 }
 0x170   :  { %v914_v29 = vadd.f32 %v913_v13, %v894_v14 }
 0x174   :  { %v933_v44 = vpop.f32.mrf.mxu3 }
 0x175   :  { %v934_v49 = vadd.f32 %v933_v44, %v914_v29 }
 0x177   :  { %v936_v32 = vadd.f32 %v934_v49, %v791_v17  ;;  %v1060_v52 = vpop.f32.mrf.mxu2 }
 0x178   :  { %v1061_v8 = vadd.f32 %v1060_v52, %v1041_v25 }
 0x179   :  { %937 = vst [vmem:[%s2580_s4] sm:$0x1] %v936_v32 }
 0x17c   :  { %v1080_v20 = vpop.f32.mrf.mxu3 }
 0x17d   :  { %v1081_v51 = vadd.f32 %v1080_v20, %v1061_v8 }
 0x17f   :  { %v1083_v28 = vadd.f32 %v1081_v51, %v938_v40 }
 0x181   :  { %1084 = vst [vmem:[%s2581_s5] sm:$0x1] %v1083_v28 }

// kernel: pixel_shuffle_block.3
= control target key start
LH: loop header
LB: loop body
LE: loop exit
PB: predicated region body
PF: predicated region fallthrough
CT: control target
= control target key end

     0   :  { %v104_v0 = vmov 0   ;;  %s221_s1 = inlined_call_operand.vmem [shape: f32[8,1], index: 1, kind: input, shape index: {}]   ;;  %s222_s2 = inlined_call_operand.vmem [shape: f32[8,1], index: 2, kind: input, shape index: {}]   ;;  %s223_s0 = inlined_call_operand.vmem [shape: bf16[2,8,1024], index: 0, kind: input, shape index: {}]   ;;  %s224_s3 = inlined_call_operand.vmem [shape: f32[2,8,1024], index: 3, kind: output, shape index: {}]  }
   0x1   :  { %103 = vset.pattern.permute.xlu0 %v104_v0  ;;  %v38_v1 = vld [vmem:[%s221_s1] sm:$0xff]  ;;  %v15_v5 = vld [vmem:[%s223_s0 + $0x8] sm:$0xff]  ;;  %v16_v6 = vld [vmem:[%s223_s0 + $0x10] sm:$0xff] }
   0x2   :  { %41 = vperm.xlu0 %103, %v38_v1   ;;  %v60_v2 = vld [vmem:[%s222_s2] sm:$0xff]  ;;  %v24_v9 = vunpack.c.l.bf16 %v15_v5  ;;  %v17_v10 = vld [vmem:[%s223_s0 + $0x18] sm:$0xff]  ;;  %v25_v11 = vunpack.c.h.bf16 %v15_v5  ;;  %v26_v13 = vunpack.c.l.bf16 %v16_v6  ;;  %v27_v14 = vunpack.c.h.bf16 %v16_v6  ;;  %v19_v20 = vld [vmem:[%s223_s0 + $0x28] sm:$0xff] }
   0x3   :  { %v14_v4 = vld [vmem:[%s223_s0] sm:$0xff]  ;;  %v28_v15 = vunpack.c.l.bf16 %v17_v10  ;;  %v29_v21 = vunpack.c.h.bf16 %v17_v10  ;;  %v20_v28 = vld [vmem:[%s223_s0 + $0x30] sm:$0xff]  ;;  %v32_v32 = vunpack.c.l.bf16 %v19_v20  ;;  %v21_v35 = vld [vmem:[%s223_s0 + $0x38] sm:$0xff]  ;;  %v33_v36 = vunpack.c.h.bf16 %v19_v20 }
   0x4   :  { %v22_v7 = vunpack.c.l.bf16 %v14_v4  ;;  %v23_v8 = vunpack.c.h.bf16 %v14_v4  ;;  %v18_v12 = vld [vmem:[%s223_s0 + $0x20] sm:$0xff]  ;;  %v34_v39 = vunpack.c.l.bf16 %v20_v28  ;;  %v35_v42 = vunpack.c.h.bf16 %v20_v28 }
   0x5   :  { %v30_v22 = vunpack.c.l.bf16 %v18_v12  ;;  %v31_v29 = vunpack.c.h.bf16 %v18_v12  ;;  %v36_v45 = vunpack.c.l.bf16 %v21_v35  ;;  %v37_v48 = vunpack.c.h.bf16 %v21_v35 }
   0xa   :  { %63 = vperm.xlu0 %103, %v60_v2  }
  0x74   :  { %v131_v3 = vpop.permute.xlu0 %41 }
  0x75   :  { %v44_v16 = vmul.f32 %v131_v3, %v22_v7  ;;  %v45_v17 = vmul.f32 %v131_v3, %v23_v8  ;;  %v46_v18 = vmul.f32 %v131_v3, %v24_v9  ;;  %v47_v23 = vmul.f32 %v131_v3, %v25_v11 }
  0x76   :  { %v48_v24 = vmul.f32 %v131_v3, %v26_v13  ;;  %v49_v30 = vmul.f32 %v131_v3, %v27_v14  ;;  %v50_v33 = vmul.f32 %v131_v3, %v28_v15  ;;  %v51_v37 = vmul.f32 %v131_v3, %v29_v21 }
  0x77   :  { %v52_v40 = vmul.f32 %v131_v3, %v30_v22  ;;  %v53_v43 = vmul.f32 %v131_v3, %v31_v29  ;;  %v54_v46 = vmul.f32 %v131_v3, %v32_v32  ;;  %v55_v49 = vmul.f32 %v131_v3, %v33_v36 }
  0x78   :  { %v56_v51 = vmul.f32 %v131_v3, %v34_v39  ;;  %v57_v53 = vmul.f32 %v131_v3, %v35_v42  ;;  %v58_v55 = vmul.f32 %v131_v3, %v36_v45  ;;  %v59_v57 = vmul.f32 %v131_v3, %v37_v48 }
  0x7c   :  { %v64_v19 = vpop.permute.xlu0 %63 }
  0x7d   :  { %v66_v25 = vadd.f32 %v64_v19, %v44_v16  ;;  %v67_v26 = vadd.f32 %v64_v19, %v45_v17  ;;  %v68_v27 = vadd.f32 %v64_v19, %v46_v18  ;;  %v69_v31 = vadd.f32 %v64_v19, %v47_v23 }
  0x7e   :  { %v70_v34 = vadd.f32 %v64_v19, %v48_v24  ;;  %v71_v38 = vadd.f32 %v64_v19, %v49_v30  ;;  %v72_v41 = vadd.f32 %v64_v19, %v50_v33  ;;  %v73_v44 = vadd.f32 %v64_v19, %v51_v37 }
  0x7f   :  { %82 = vst [vmem:[%s224_s3] sm:$0xff] %v66_v25  ;;  %v74_v47 = vadd.f32 %v64_v19, %v52_v40  ;;  %v75_v50 = vadd.f32 %v64_v19, %v53_v43  ;;  %v76_v52 = vadd.f32 %v64_v19, %v54_v46  ;;  %v77_v54 = vadd.f32 %v64_v19, %v55_v49 }
  0x80   :  { %83 = vst [vmem:[%s224_s3 + $0x8] sm:$0xff] %v67_v26  ;;  %v78_v56 = vadd.f32 %v64_v19, %v56_v51  ;;  %v79_v58 = vadd.f32 %v64_v19, %v57_v53  ;;  %v80_v59 = vadd.f32 %v64_v19, %v58_v55  ;;  %v81_v60 = vadd.f32 %v64_v19, %v59_v57 }
  0x81   :  { %84 = vst [vmem:[%s224_s3 + $0x10] sm:$0xff] %v68_v27 }
  0x82   :  { %85 = vst [vmem:[%s224_s3 + $0x18] sm:$0xff] %v69_v31 }
  0x83   :  { %86 = vst [vmem:[%s224_s3 + $0x20] sm:$0xff] %v70_v34 }
  0x84   :  { %87 = vst [vmem:[%s224_s3 + $0x28] sm:$0xff] %v71_v38 }
  0x85   :  { %88 = vst [vmem:[%s224_s3 + $0x30] sm:$0xff] %v72_v41 }
  0x86   :  { %89 = vst [vmem:[%s224_s3 + $0x38] sm:$0xff] %v73_v44 }
  0x87   :  { %90 = vst [vmem:[%s224_s3 + $0x40] sm:$0xff] %v74_v47 }
  0x88   :  { %91 = vst [vmem:[%s224_s3 + $0x48] sm:$0xff] %v75_v50 }
  0x89   :  { %92 = vst [vmem:[%s224_s3 + $0x50] sm:$0xff] %v76_v52 }
  0x8a   :  { %93 = vst [vmem:[%s224_s3 + $0x58] sm:$0xff] %v77_v54 }
  0x8b   :  { %94 = vst [vmem:[%s224_s3 + $0x60] sm:$0xff] %v78_v56 }
  0x8c   :  { %95 = vst [vmem:[%s224_s3 + $0x68] sm:$0xff] %v79_v58 }
  0x8d   :  { %96 = vst [vmem:[%s224_s3 + $0x70] sm:$0xff] %v80_v59 }
  0x8e   :  { %97 = vst [vmem:[%s224_s3 + $0x78] sm:$0xff] %v81_v60 }

</bundles_post_ra>
